<compile_context>
chip_gen: v7x
topology: tpu7x:2x2x1
jax: 0.10.0
libtpu: 0.0.40
codegen_flags: <defaults>
</compile_context>

<pallas_src>
import functools

import jax
import jax.numpy as jnp
import numpy as np
from jax.experimental import pallas as pl
from jax.experimental.pallas import tpu as pltpu


def upsample_conv_kernel(x_ref, w_ref, b_ref, out_ref, st_scr, *, H, W, C, TH):
    """One (batch, row-tile) grid step.

    x_ref  : (1, H, W, C)    f32   full-height input (resident across row tiles)
    w_ref  : (4, 4C, C)      bf16  folded upsample+conv weights, parity-major
    b_ref  : (1, C)          f32   conv bias
    out_ref: (1, 4, TH*W, C) f32   parity-major output rows of this tile
    st_scr : (2, TH+1, W, 4C) bf16 per-column-parity tap slabs (K=4C operands)
    """
    j = pl.program_id(1)
    nj = pl.num_programs(1)
    h0 = j * TH                         # first original-resolution row of tile

    # ---- padded-row slab for this tile, (TH+2, W, C), built as a value ------
    # Slab row r holds padded-image row (h0 + r); out-of-image halo rows are
    # zeroed via a scalar multiply (boundary tiles only).  Leading-axis concat
    # of whole (W, C) slabs -> no sublane relayout.
    top = x_ref[0, pl.ds(jnp.maximum(h0 - 1, 0), 1)]
    top = top * (j > 0).astype(top.dtype)
    mid = x_ref[0, pl.ds(h0, TH)]
    bot = x_ref[0, pl.ds(jnp.minimum(h0 + TH, H - 1), 1)]
    bot = bot * (j < nj - 1).astype(bot.dtype)
    xv = jnp.concatenate([top, mid, bot], axis=0)            # (TH+2, W, C) f32

    col = jax.lax.broadcasted_iota(jnp.int32, xv.shape, 1)

    def put(cs, pairs):
        # cs[r, w] = P[h0 + r, w + c] for column offset c = dq + sx of `pairs`.
        cs = cs.astype(st_scr.dtype)                         # cast once, bf16
        for dq, sx in pairs:
            for sy in (0, 1):
                t = sy * 2 + sx                              # lane block (sy,sx)
                st_scr[dq, :, :, t * C:(t + 1) * C] = cs[sy:sy + TH + 1]

    # Column offset 1 is the image itself; offsets 0 / 2 are right / left
    # shifts (XLU roll) with the wrapped boundary column zeroed (VPU select).
    put(xv, ((0, 1), (1, 0)))                                             # c=1
    put(jnp.where(col == 0, 0.0, pltpu.roll(xv, shift=1, axis=1)),        # c=0
        ((0, 0),))
    put(jnp.where(col == W - 1, 0.0, pltpu.roll(xv, shift=W - 1, axis=1)),
        ((1, 1),))                                                        # c=2

    bias = b_ref[...]                                        # (1, C) f32

    # ---- one K=4C MXU matmul per output parity ------------------------------
    for dp in range(2):
        for dq in range(2):
            # Contiguous leading-axis slice of the scratch; (TH, W, 4C) ->
            # (TH*W, 4C) keeps whole (W, 4C) tiles, so the reshape is a view.
            xs = st_scr[dq, dp:dp + TH].reshape(TH * W, 4 * C)
            acc = jnp.dot(xs, w_ref[dp * 2 + dq],
                          preferred_element_type=jnp.float32)   # (TH*W, C)
            out_ref[0, dp * 2 + dq] = (acc + bias).astype(out_ref.dtype)


def _pick_tile_rows(H, W, C):
    # Per-step f32 output block is 4*TH*W*C*4 bytes; keep it <= ~2 MiB so the
    # double-buffered blocks + scratch stay well inside v7x's 64 MiB VMEM, and
    # cap at 8 rows so even small maps get several grid steps to pipeline over.
    cap = max(1, (2 << 20) // (16 * W * C))
    th = max(1, min(H, 8, cap))
    while H % th:
        th -= 1
    return th


def upsample_nhwc_parity(x_nhwc, w_hwio, bias, out_dtype=jnp.float32):
    """Core Pallas call.  x: (B, H, W, C) NHWC.  Returns parity-major
    (B, 4, H*W, C) with out[b, dp*2+dq, h*W+w] = y[b, 2h+dp, 2w+dq]."""
    B, H, W, C = x_nhwc.shape
    assert W % 8 == 0 and C % 128 == 0, "demo assumes lane/sublane-dense blocks"
    # TODO(synk): for C < 128 or ragged W, zero-pad the weight channel dims / W
    # in HBM (free) instead of asserting.

    # Fold the nearest-2x upsample into the 3x3 conv: per output parity (dp,dq)
    # and 2x2 tap (sy,sx), sum the conv taps that read the same original-res
    # pixel.  A[dp, sy, ky] = 1 iff conv tap row ky reads input row offset
    # (dp - 1 + sy) for outputs of row parity dp (identically for columns).
    A = jnp.array([[[1., 0., 0.],
                    [0., 1., 1.]],
                   [[1., 1., 0.],
                    [0., 0., 1.]]], jnp.float32)
    w = w_hwio.astype(jnp.float32)                         # (3,3,Cin,Cout) HWIO
    weff = jnp.einsum('pyk,qxl,klio->pqyxio', A, A, w)     # (2,2,2,2,C,C)
    # p = dp*2+dq on dim0; K dim flattens (sy, sx, Cin) -> matches operand lanes.
    weff = weff.reshape(4, 4 * C, C).astype(jnp.bfloat16)
    brow = bias.reshape(1, C).astype(jnp.float32)

    TH = _pick_tile_rows(H, W, C)
    grid = (B, H // TH)

    kern = functools.partial(upsample_conv_kernel, H=H, W=W, C=C, TH=TH)

    # VMEM budget from actual buffer sizes (+ headroom), not the whole chip.
    x_blk = H * W * C * 4
    w_blk = 4 * 4 * C * C * 2
    out_blk = 4 * TH * W * C * jnp.dtype(out_dtype).itemsize
    scr_blk = 2 * (TH + 1) * W * 4 * C * 2
    vmem_bytes = int(min(48 * 1024 * 1024,
                         2 * (x_blk + w_blk + out_blk + 4 * C)
                         + scr_blk + (8 << 20)))

    flops = 2 * B * 16 * H * W * C * C            # 4 parities x K=4C per pixel
    bytes_accessed = B * x_blk + w_blk + 4 * C + B * 4 * H * W * C * 4

    return pl.pallas_call(
        kern,
        out_shape=jax.ShapeDtypeStruct((B, 4, H * W, C), out_dtype),
        grid_spec=pltpu.PrefetchScalarGridSpec(
            num_scalar_prefetch=0,
            grid=grid,
            in_specs=[
                pl.BlockSpec((1, H, W, C), lambda i, j: (i, 0, 0, 0)),
                pl.BlockSpec((4, 4 * C, C), lambda i, j: (0, 0, 0)),
                pl.BlockSpec((1, C), lambda i, j: (0, 0)),
            ],
            out_specs=pl.BlockSpec((1, 4, TH * W, C),
                                   lambda i, j: (i, 0, j, 0)),
            scratch_shapes=[pltpu.VMEM((2, TH + 1, W, 4 * C), jnp.bfloat16)],
        ),
        compiler_params=pltpu.CompilerParams(
            dimension_semantics=("parallel", "parallel"),
            vmem_limit_bytes=vmem_bytes,
        ),
        cost_estimate=pl.CostEstimate(flops=flops, transcendentals=0,
                                      bytes_accessed=bytes_accessed),
    )(x_nhwc.astype(jnp.float32), weff, brow)


def upsample(x_nchw, temb, w_hwio, bias):
    """PyTorch-interface adapter (NCHW in / NCHW out) for UpSample.forward.

    temb is accepted to mirror the module signature but is unused (as in the
    module).  The transposes / parity de-interleave here exist only so the
    result can be checked against the NCHW reference; inside a model keep
    NHWC + parity-major (review item) to avoid these extra HBM passes.
    """
    del temb
    B, C, H, W = x_nchw.shape
    x = jnp.transpose(x_nchw, (0, 2, 3, 1))                    # NHWC
    out_pm = upsample_nhwc_parity(x, w_hwio, bias)             # (B, 4, H*W, C)
    out = out_pm.reshape(B, 2, 2, H, W, C)
    out = jnp.transpose(out, (0, 5, 3, 1, 4, 2))               # b, c, h, dp, w, dq
    return out.reshape(B, C, 2 * H, 2 * W)


def ref_upsample(x_nchw, w_hwio, bias):
    """Pure-JAX reference matching the PyTorch module semantics (f32)."""
    up = jnp.repeat(jnp.repeat(x_nchw, 2, axis=2), 2, axis=3)  # nearest, x2
    up_nhwc = jnp.transpose(up, (0, 2, 3, 1))
    y = jax.lax.conv_general_dilated(
        up_nhwc, w_hwio, (1, 1), "SAME",
        dimension_numbers=("NHWC", "HWIO", "NHWC"))
    y = y + bias
    return jnp.transpose(y, (0, 3, 1, 2))


if __name__ == "__main__":
    # UpSample(in_ch=128) on a 16x16 feature map (typical decoder stage);
    # C=128 keeps the channel (lane) dimension dense per the perf review.
    B, C, H, W = 2, 128, 16, 16
    TDIM = 256

    key = jax.random.PRNGKey(0)
    k1, k2, k3, k4 = jax.random.split(key, 4)
    x = jax.random.normal(k1, (B, C, H, W), jnp.float32)
    temb = jax.random.normal(k2, (B, TDIM), jnp.float32)       # accepted, unused

    limit = float(np.sqrt(6.0 / (9 * C + 9 * C)))              # xavier_uniform bound
    w_hwio = jax.random.uniform(k3, (3, 3, C, C), jnp.float32,
                                minval=-limit, maxval=limit)
    bias = 0.02 * jax.random.normal(k4, (C,), jnp.float32)     # exercise bias path

    out = upsample(x, temb, w_hwio, bias)
    out = jax.block_until_ready(out)
    assert out.shape == (B, C, 2 * H, 2 * W)

    ref = ref_upsample(x, w_hwio, bias)
    # bf16 MXU operands (review item) -> tolerance relaxed vs the f32 reference.
    np.testing.assert_allclose(np.asarray(out), np.asarray(ref),
                               rtol=5e-2, atol=5e-2)
    print("KERNEL_OK")
</pallas_src>

<mosaic_0001>
module attributes {stable_mosaic.version = 11 : i64} {
  func.func @upsample_conv_kernel(%arg0: i32, %arg1: i32, %arg2: memref<1x16x16x128xf32, #tpu.memory_space<vmem>>, %arg3: memref<4x512x128xbf16, #tpu.memory_space<vmem>>, %arg4: memref<1x128xf32, #tpu.memory_space<vmem>>, %arg5: memref<1x4x128x128xf32, #tpu.memory_space<vmem>>, %arg6: memref<2x9x16x512xbf16, #tpu.memory_space<vmem>>) attributes {dimension_semantics = [#tpu.dimension_semantics<parallel>, #tpu.dimension_semantics<parallel>], iteration_bounds = array<i64: 2, 2>, scalar_prefetch = 0 : i64, scratch_operands = 1 : i64, tpu.core_type = #tpu.core_type<tc>, window_params = [{transform_indices = @transform_0, window_bounds = array<i64: 1, 16, 16, 128>}, {pipeline_mode = #tpu.pipeline_mode<synchronous>, transform_indices = @transform_1, window_bounds = array<i64: 4, 512, 128>}, {pipeline_mode = #tpu.pipeline_mode<synchronous>, transform_indices = @transform_2, window_bounds = array<i64: 1, 128>}, {transform_indices = @transform_3, window_bounds = array<i64: 1, 4, 128, 128>}]} {
    %c8_i32 = arith.constant 8 : i32
    %0 = arith.muli %arg1, %c8_i32 : i32
    %c1_i32 = arith.constant 1 : i32
    %1 = arith.subi %0, %c1_i32 : i32
    %c0_i32 = arith.constant 0 : i32
    %2 = arith.maxsi %1, %c0_i32 : i32
    %c0 = arith.constant 0 : index
    %3 = arith.index_cast %2 : i32 to index
    %c0_0 = arith.constant 0 : index
    %c0_1 = arith.constant 0 : index
    %4 = vector.load %arg2[%c0, %3, %c0_0, %c0_1] : memref<1x16x16x128xf32, #tpu.memory_space<vmem>>, vector<1x1x16x128xf32>
    %5 = vector.shape_cast %4 : vector<1x1x16x128xf32> to vector<1x16x128xf32>
    %c0_i32_2 = arith.constant 0 : i32
    %6 = arith.cmpi sgt, %arg1, %c0_i32_2 : i32
    %7 = arith.extui %6 : i1 to i32
    %8 = arith.sitofp %7 : i32 to f32
    %9 = vector.broadcast %8 : f32 to vector<1x16x128xf32>
    %10 = arith.mulf %5, %9 : vector<1x16x128xf32>
    %c0_3 = arith.constant 0 : index
    %11 = arith.index_cast %0 : i32 to index
    %c0_4 = arith.constant 0 : index
    %c0_5 = arith.constant 0 : index
    %12 = vector.load %arg2[%c0_3, %11, %c0_4, %c0_5] : memref<1x16x16x128xf32, #tpu.memory_space<vmem>>, vector<1x8x16x128xf32>
    %13 = vector.shape_cast %12 : vector<1x8x16x128xf32> to vector<8x16x128xf32>
    %c8_i32_6 = arith.constant 8 : i32
    %14 = arith.addi %0, %c8_i32_6 : i32
    %c15_i32 = arith.constant 15 : i32
    %15 = arith.minsi %14, %c15_i32 : i32
    %c0_7 = arith.constant 0 : index
    %16 = arith.index_cast %15 : i32 to index
    %c0_8 = arith.constant 0 : index
    %c0_9 = arith.constant 0 : index
    %17 = vector.load %arg2[%c0_7, %16, %c0_8, %c0_9] : memref<1x16x16x128xf32, #tpu.memory_space<vmem>>, vector<1x1x16x128xf32>
    %18 = vector.shape_cast %17 : vector<1x1x16x128xf32> to vector<1x16x128xf32>
    %c1_i32_10 = arith.constant 1 : i32
    %19 = arith.cmpi slt, %arg1, %c1_i32_10 : i32
    %20 = arith.extui %19 : i1 to i32
    %21 = arith.sitofp %20 : i32 to f32
    %22 = vector.broadcast %21 : f32 to vector<1x16x128xf32>
    %23 = arith.mulf %18, %22 : vector<1x16x128xf32>
    %24 = tpu.concatenate %10, %13, %23 in 0 : vector<1x16x128xf32>, vector<8x16x128xf32>, vector<1x16x128xf32> -> vector<10x16x128xf32>
    %25 = tpu.iota {dimensions = array<i32: 1>} : vector<10x16x128xi32>
    %26 = arith.truncf %24 : vector<10x16x128xf32> to vector<10x16x128xbf16>
    %27 = vector.extract_strided_slice %26 {offsets = [0, 0, 0], sizes = [9, 16, 128], strides = [1, 1, 1]} : vector<10x16x128xbf16> to vector<9x16x128xbf16>
    %c0_11 = arith.constant 0 : index
    %c0_12 = arith.constant 0 : index
    %c0_13 = arith.constant 0 : index
    %c128 = arith.constant 128 : index
    %28 = vector.load %arg6[%c0_11, %c0_12, %c0_13, %c128] : memref<2x9x16x512xbf16, #tpu.memory_space<vmem>>, vector<1x9x16x128xbf16>
    %29 = vector.shape_cast %28 : vector<1x9x16x128xbf16> to vector<9x16x128xbf16>
    %30 = vector.shape_cast %27 : vector<9x16x128xbf16> to vector<1x9x16x128xbf16>
    tpu.vector_store %arg6[%c0_11, %c0_12, %c0_13, %c128], %30 {strides = array<i32>} : memref<2x9x16x512xbf16, #tpu.memory_space<vmem>>, vector<1x9x16x128xbf16>,
    %31 = vector.extract_strided_slice %26 {offsets = [1, 0, 0], sizes = [9, 16, 128], strides = [1, 1, 1]} : vector<10x16x128xbf16> to vector<9x16x128xbf16>
    %c0_14 = arith.constant 0 : index
    %c0_15 = arith.constant 0 : index
    %c0_16 = arith.constant 0 : index
    %c384 = arith.constant 384 : index
    %32 = vector.load %arg6[%c0_14, %c0_15, %c0_16, %c384] : memref<2x9x16x512xbf16, #tpu.memory_space<vmem>>, vector<1x9x16x128xbf16>
    %33 = vector.shape_cast %32 : vector<1x9x16x128xbf16> to vector<9x16x128xbf16>
    %34 = vector.shape_cast %31 : vector<9x16x128xbf16> to vector<1x9x16x128xbf16>
    tpu.vector_store %arg6[%c0_14, %c0_15, %c0_16, %c384], %34 {strides = array<i32>} : memref<2x9x16x512xbf16, #tpu.memory_space<vmem>>, vector<1x9x16x128xbf16>,
    %35 = vector.extract_strided_slice %26 {offsets = [0, 0, 0], sizes = [9, 16, 128], strides = [1, 1, 1]} : vector<10x16x128xbf16> to vector<9x16x128xbf16>
    %c1 = arith.constant 1 : index
    %c0_17 = arith.constant 0 : index
    %c0_18 = arith.constant 0 : index
    %c0_19 = arith.constant 0 : index
    %36 = vector.load %arg6[%c1, %c0_17, %c0_18, %c0_19] : memref<2x9x16x512xbf16, #tpu.memory_space<vmem>>, vector<1x9x16x128xbf16>
    %37 = vector.shape_cast %36 : vector<1x9x16x128xbf16> to vector<9x16x128xbf16>
    %38 = vector.shape_cast %35 : vector<9x16x128xbf16> to vector<1x9x16x128xbf16>
    tpu.vector_store %arg6[%c1, %c0_17, %c0_18, %c0_19], %38 {strides = array<i32>} : memref<2x9x16x512xbf16, #tpu.memory_space<vmem>>, vector<1x9x16x128xbf16>,
    %39 = vector.extract_strided_slice %26 {offsets = [1, 0, 0], sizes = [9, 16, 128], strides = [1, 1, 1]} : vector<10x16x128xbf16> to vector<9x16x128xbf16>
    %c1_20 = arith.constant 1 : index
    %c0_21 = arith.constant 0 : index
    %c0_22 = arith.constant 0 : index
    %c256 = arith.constant 256 : index
    %40 = vector.load %arg6[%c1_20, %c0_21, %c0_22, %c256] : memref<2x9x16x512xbf16, #tpu.memory_space<vmem>>, vector<1x9x16x128xbf16>
    %41 = vector.shape_cast %40 : vector<1x9x16x128xbf16> to vector<9x16x128xbf16>
    %42 = vector.shape_cast %39 : vector<9x16x128xbf16> to vector<1x9x16x128xbf16>
    tpu.vector_store %arg6[%c1_20, %c0_21, %c0_22, %c256], %42 {strides = array<i32>} : memref<2x9x16x512xbf16, #tpu.memory_space<vmem>>, vector<1x9x16x128xbf16>,
    %c0_i32_23 = arith.constant 0 : i32
    %43 = vector.broadcast %c0_i32_23 : i32 to vector<10x16x128xi32>
    %44 = arith.cmpi eq, %25, %43 : vector<10x16x128xi32>
    %c1_i32_24 = arith.constant 1 : i32
    %45 = tpu.dynamic_rotate %24 by %c1_i32_24 dim 1 : vector<10x16x128xf32>, i32 -> vector<10x16x128xf32>
    %cst = arith.constant 0.000000e+00 : f32
    %46 = vector.broadcast %cst : f32 to vector<10x16x128xf32>
    %47 = arith.select %44, %46, %45 : vector<10x16x128xi1>, vector<10x16x128xf32>
    %48 = arith.truncf %47 : vector<10x16x128xf32> to vector<10x16x128xbf16>
    %49 = vector.extract_strided_slice %48 {offsets = [0, 0, 0], sizes = [9, 16, 128], strides = [1, 1, 1]} : vector<10x16x128xbf16> to vector<9x16x128xbf16>
    %c0_25 = arith.constant 0 : index
    %c0_26 = arith.constant 0 : index
    %c0_27 = arith.constant 0 : index
    %c0_28 = arith.constant 0 : index
    %50 = vector.load %arg6[%c0_25, %c0_26, %c0_27, %c0_28] : memref<2x9x16x512xbf16, #tpu.memory_space<vmem>>, vector<1x9x16x128xbf16>
    %51 = vector.shape_cast %50 : vector<1x9x16x128xbf16> to vector<9x16x128xbf16>
    %52 = vector.shape_cast %49 : vector<9x16x128xbf16> to vector<1x9x16x128xbf16>
    tpu.vector_store %arg6[%c0_25, %c0_26, %c0_27, %c0_28], %52 {strides = array<i32>} : memref<2x9x16x512xbf16, #tpu.memory_space<vmem>>, vector<1x9x16x128xbf16>,
    %53 = vector.extract_strided_slice %48 {offsets = [1, 0, 0], sizes = [9, 16, 128], strides = [1, 1, 1]} : vector<10x16x128xbf16> to vector<9x16x128xbf16>
    %c0_29 = arith.constant 0 : index
    %c0_30 = arith.constant 0 : index
    %c0_31 = arith.constant 0 : index
    %c256_32 = arith.constant 256 : index
    %54 = vector.load %arg6[%c0_29, %c0_30, %c0_31, %c256_32] : memref<2x9x16x512xbf16, #tpu.memory_space<vmem>>, vector<1x9x16x128xbf16>
    %55 = vector.shape_cast %54 : vector<1x9x16x128xbf16> to vector<9x16x128xbf16>
    %56 = vector.shape_cast %53 : vector<9x16x128xbf16> to vector<1x9x16x128xbf16>
    tpu.vector_store %arg6[%c0_29, %c0_30, %c0_31, %c256_32], %56 {strides = array<i32>} : memref<2x9x16x512xbf16, #tpu.memory_space<vmem>>, vector<1x9x16x128xbf16>,
    %c15_i32_33 = arith.constant 15 : i32
    %57 = vector.broadcast %c15_i32_33 : i32 to vector<10x16x128xi32>
    %58 = arith.cmpi eq, %25, %57 : vector<10x16x128xi32>
    %c15_i32_34 = arith.constant 15 : i32
    %59 = tpu.dynamic_rotate %24 by %c15_i32_34 dim 1 : vector<10x16x128xf32>, i32 -> vector<10x16x128xf32>
    %cst_35 = arith.constant 0.000000e+00 : f32
    %60 = vector.broadcast %cst_35 : f32 to vector<10x16x128xf32>
    %61 = arith.select %58, %60, %59 : vector<10x16x128xi1>, vector<10x16x128xf32>
    %62 = arith.truncf %61 : vector<10x16x128xf32> to vector<10x16x128xbf16>
    %63 = vector.extract_strided_slice %62 {offsets = [0, 0, 0], sizes = [9, 16, 128], strides = [1, 1, 1]} : vector<10x16x128xbf16> to vector<9x16x128xbf16>
    %c1_36 = arith.constant 1 : index
    %c0_37 = arith.constant 0 : index
    %c0_38 = arith.constant 0 : index
    %c128_39 = arith.constant 128 : index
    %64 = vector.load %arg6[%c1_36, %c0_37, %c0_38, %c128_39] : memref<2x9x16x512xbf16, #tpu.memory_space<vmem>>, vector<1x9x16x128xbf16>
    %65 = vector.shape_cast %64 : vector<1x9x16x128xbf16> to vector<9x16x128xbf16>
    %66 = vector.shape_cast %63 : vector<9x16x128xbf16> to vector<1x9x16x128xbf16>
    tpu.vector_store %arg6[%c1_36, %c0_37, %c0_38, %c128_39], %66 {strides = array<i32>} : memref<2x9x16x512xbf16, #tpu.memory_space<vmem>>, vector<1x9x16x128xbf16>,
    %67 = vector.extract_strided_slice %62 {offsets = [1, 0, 0], sizes = [9, 16, 128], strides = [1, 1, 1]} : vector<10x16x128xbf16> to vector<9x16x128xbf16>
    %c1_40 = arith.constant 1 : index
    %c0_41 = arith.constant 0 : index
    %c0_42 = arith.constant 0 : index
    %c384_43 = arith.constant 384 : index
    %68 = vector.load %arg6[%c1_40, %c0_41, %c0_42, %c384_43] : memref<2x9x16x512xbf16, #tpu.memory_space<vmem>>, vector<1x9x16x128xbf16>
    %69 = vector.shape_cast %68 : vector<1x9x16x128xbf16> to vector<9x16x128xbf16>
    %70 = vector.shape_cast %67 : vector<9x16x128xbf16> to vector<1x9x16x128xbf16>
    tpu.vector_store %arg6[%c1_40, %c0_41, %c0_42, %c384_43], %70 {strides = array<i32>} : memref<2x9x16x512xbf16, #tpu.memory_space<vmem>>, vector<1x9x16x128xbf16>,
    %c0_44 = arith.constant 0 : index
    %c0_45 = arith.constant 0 : index
    %71 = vector.load %arg4[%c0_44, %c0_45] : memref<1x128xf32, #tpu.memory_space<vmem>>, vector<1x128xf32>
    %c0_46 = arith.constant 0 : index
    %c0_47 = arith.constant 0 : index
    %c0_48 = arith.constant 0 : index
    %c0_49 = arith.constant 0 : index
    %72 = vector.load %arg6[%c0_46, %c0_47, %c0_48, %c0_49] : memref<2x9x16x512xbf16, #tpu.memory_space<vmem>>, vector<1x8x16x512xbf16>
    %73 = vector.shape_cast %72 : vector<1x8x16x512xbf16> to vector<8x16x512xbf16>
    %74 = vector.shape_cast %73 : vector<8x16x512xbf16> to vector<128x512xbf16>
    %c0_50 = arith.constant 0 : index
    %c0_51 = arith.constant 0 : index
    %c0_52 = arith.constant 0 : index
    %75 = vector.load %arg3[%c0_50, %c0_51, %c0_52] : memref<4x512x128xbf16, #tpu.memory_space<vmem>>, vector<1x512x128xbf16>
    %76 = vector.shape_cast %75 : vector<1x512x128xbf16> to vector<512x128xbf16>
    %cst_53 = arith.constant dense<0.000000e+00> : vector<128x128xf32>
    %77 = tpu.matmul %74, %76, %cst_53 {dimension_numbers = #tpu.dot_dimension_numbers<[1], [0], [0], [1], [0, 0, 1, 1], [], []>} : vector<128x512xbf16>, vector<512x128xbf16>, vector<128x128xf32> -> vector<128x128xf32>
    %78 = vector.broadcast %71 : vector<1x128xf32> to vector<128x128xf32>
    %79 = arith.addf %77, %78 : vector<128x128xf32>
    %c0_54 = arith.constant 0 : index
    %c0_55 = arith.constant 0 : index
    %c0_56 = arith.constant 0 : index
    %c0_57 = arith.constant 0 : index
    %80 = vector.load %arg5[%c0_54, %c0_55, %c0_56, %c0_57] : memref<1x4x128x128xf32, #tpu.memory_space<vmem>>, vector<1x1x128x128xf32>
    %81 = vector.shape_cast %80 : vector<1x1x128x128xf32> to vector<128x128xf32>
    %82 = vector.shape_cast %79 : vector<128x128xf32> to vector<1x1x128x128xf32>
    tpu.vector_store %arg5[%c0_54, %c0_55, %c0_56, %c0_57], %82 {strides = array<i32>} : memref<1x4x128x128xf32, #tpu.memory_space<vmem>>, vector<1x1x128x128xf32>,
    %c1_58 = arith.constant 1 : index
    %c0_59 = arith.constant 0 : index
    %c0_60 = arith.constant 0 : index
    %c0_61 = arith.constant 0 : index
    %83 = vector.load %arg6[%c1_58, %c0_59, %c0_60, %c0_61] : memref<2x9x16x512xbf16, #tpu.memory_space<vmem>>, vector<1x8x16x512xbf16>
    %84 = vector.shape_cast %83 : vector<1x8x16x512xbf16> to vector<8x16x512xbf16>
    %85 = vector.shape_cast %84 : vector<8x16x512xbf16> to vector<128x512xbf16>
    %c1_62 = arith.constant 1 : index
    %c0_63 = arith.constant 0 : index
    %c0_64 = arith.constant 0 : index
    %86 = vector.load %arg3[%c1_62, %c0_63, %c0_64] : memref<4x512x128xbf16, #tpu.memory_space<vmem>>, vector<1x512x128xbf16>
    %87 = vector.shape_cast %86 : vector<1x512x128xbf16> to vector<512x128xbf16>
    %cst_65 = arith.constant dense<0.000000e+00> : vector<128x128xf32>
    %88 = tpu.matmul %85, %87, %cst_65 {dimension_numbers = #tpu.dot_dimension_numbers<[1], [0], [0], [1], [0, 0, 1, 1], [], []>} : vector<128x512xbf16>, vector<512x128xbf16>, vector<128x128xf32> -> vector<128x128xf32>
    %89 = vector.broadcast %71 : vector<1x128xf32> to vector<128x128xf32>
    %90 = arith.addf %88, %89 : vector<128x128xf32>
    %c0_66 = arith.constant 0 : index
    %c1_67 = arith.constant 1 : index
    %c0_68 = arith.constant 0 : index
    %c0_69 = arith.constant 0 : index
    %91 = vector.load %arg5[%c0_66, %c1_67, %c0_68, %c0_69] : memref<1x4x128x128xf32, #tpu.memory_space<vmem>>, vector<1x1x128x128xf32>
    %92 = vector.shape_cast %91 : vector<1x1x128x128xf32> to vector<128x128xf32>
    %93 = vector.shape_cast %90 : vector<128x128xf32> to vector<1x1x128x128xf32>
    tpu.vector_store %arg5[%c0_66, %c1_67, %c0_68, %c0_69], %93 {strides = array<i32>} : memref<1x4x128x128xf32, #tpu.memory_space<vmem>>, vector<1x1x128x128xf32>,
    %c0_70 = arith.constant 0 : index
    %c1_71 = arith.constant 1 : index
    %c0_72 = arith.constant 0 : index
    %c0_73 = arith.constant 0 : index
    %94 = vector.load %arg6[%c0_70, %c1_71, %c0_72, %c0_73] : memref<2x9x16x512xbf16, #tpu.memory_space<vmem>>, vector<1x8x16x512xbf16>
    %95 = vector.shape_cast %94 : vector<1x8x16x512xbf16> to vector<8x16x512xbf16>
    %96 = vector.shape_cast %95 : vector<8x16x512xbf16> to vector<128x512xbf16>
    %c2 = arith.constant 2 : index
    %c0_74 = arith.constant 0 : index
    %c0_75 = arith.constant 0 : index
    %97 = vector.load %arg3[%c2, %c0_74, %c0_75] : memref<4x512x128xbf16, #tpu.memory_space<vmem>>, vector<1x512x128xbf16>
    %98 = vector.shape_cast %97 : vector<1x512x128xbf16> to vector<512x128xbf16>
    %cst_76 = arith.constant dense<0.000000e+00> : vector<128x128xf32>
    %99 = tpu.matmul %96, %98, %cst_76 {dimension_numbers = #tpu.dot_dimension_numbers<[1], [0], [0], [1], [0, 0, 1, 1], [], []>} : vector<128x512xbf16>, vector<512x128xbf16>, vector<128x128xf32> -> vector<128x128xf32>
    %100 = vector.broadcast %71 : vector<1x128xf32> to vector<128x128xf32>
    %101 = arith.addf %99, %100 : vector<128x128xf32>
    %c0_77 = arith.constant 0 : index
    %c2_78 = arith.constant 2 : index
    %c0_79 = arith.constant 0 : index
    %c0_80 = arith.constant 0 : index
    %102 = vector.load %arg5[%c0_77, %c2_78, %c0_79, %c0_80] : memref<1x4x128x128xf32, #tpu.memory_space<vmem>>, vector<1x1x128x128xf32>
    %103 = vector.shape_cast %102 : vector<1x1x128x128xf32> to vector<128x128xf32>
    %104 = vector.shape_cast %101 : vector<128x128xf32> to vector<1x1x128x128xf32>
    tpu.vector_store %arg5[%c0_77, %c2_78, %c0_79, %c0_80], %104 {strides = array<i32>} : memref<1x4x128x128xf32, #tpu.memory_space<vmem>>, vector<1x1x128x128xf32>,
    %c1_81 = arith.constant 1 : index
    %c1_82 = arith.constant 1 : index
    %c0_83 = arith.constant 0 : index
    %c0_84 = arith.constant 0 : index
    %105 = vector.load %arg6[%c1_81, %c1_82, %c0_83, %c0_84] : memref<2x9x16x512xbf16, #tpu.memory_space<vmem>>, vector<1x8x16x512xbf16>
    %106 = vector.shape_cast %105 : vector<1x8x16x512xbf16> to vector<8x16x512xbf16>
    %107 = vector.shape_cast %106 : vector<8x16x512xbf16> to vector<128x512xbf16>
    %c3 = arith.constant 3 : index
    %c0_85 = arith.constant 0 : index
    %c0_86 = arith.constant 0 : index
    %108 = vector.load %arg3[%c3, %c0_85, %c0_86] : memref<4x512x128xbf16, #tpu.memory_space<vmem>>, vector<1x512x128xbf16>
    %109 = vector.shape_cast %108 : vector<1x512x128xbf16> to vector<512x128xbf16>
    %cst_87 = arith.constant dense<0.000000e+00> : vector<128x128xf32>
    %110 = tpu.matmul %107, %109, %cst_87 {dimension_numbers = #tpu.dot_dimension_numbers<[1], [0], [0], [1], [0, 0, 1, 1], [], []>} : vector<128x512xbf16>, vector<512x128xbf16>, vector<128x128xf32> -> vector<128x128xf32>
    %111 = vector.broadcast %71 : vector<1x128xf32> to vector<128x128xf32>
    %112 = arith.addf %110, %111 : vector<128x128xf32>
    %c0_88 = arith.constant 0 : index
    %c3_89 = arith.constant 3 : index
    %c0_90 = arith.constant 0 : index
    %c0_91 = arith.constant 0 : index
    %113 = vector.load %arg5[%c0_88, %c3_89, %c0_90, %c0_91] : memref<1x4x128x128xf32, #tpu.memory_space<vmem>>, vector<1x1x128x128xf32>
    %114 = vector.shape_cast %113 : vector<1x1x128x128xf32> to vector<128x128xf32>
    %115 = vector.shape_cast %112 : vector<128x128xf32> to vector<1x1x128x128xf32>
    tpu.vector_store %arg5[%c0_88, %c3_89, %c0_90, %c0_91], %115 {strides = array<i32>} : memref<1x4x128x128xf32, #tpu.memory_space<vmem>>, vector<1x1x128x128xf32>,
    return
  }
  func.func @transform_0(%arg0: i32, %arg1: i32) -> (i32, i32, i32, i32) {
    %c0_i32 = arith.constant 0 : i32
    %c0_i32_0 = arith.constant 0 : i32
    %c0_i32_1 = arith.constant 0 : i32
    %c0_i32_2 = arith.constant 0 : i32
    return %arg0, %c0_i32, %c0_i32_0, %c0_i32_1 : i32, i32, i32, i32
  }
  func.func @transform_1(%arg0: i32, %arg1: i32) -> (i32, i32, i32) {
    %c0_i32 = arith.constant 0 : i32
    %c0_i32_0 = arith.constant 0 : i32
    %c0_i32_1 = arith.constant 0 : i32
    %c0_i32_2 = arith.constant 0 : i32
    return %c0_i32, %c0_i32_0, %c0_i32_1 : i32, i32, i32
  }
  func.func @transform_2(%arg0: i32, %arg1: i32) -> (i32, i32) {
    %c0_i32 = arith.constant 0 : i32
    %c0_i32_0 = arith.constant 0 : i32
    %c0_i32_1 = arith.constant 0 : i32
    return %c0_i32, %c0_i32_0 : i32, i32
  }
  func.func @transform_3(%arg0: i32, %arg1: i32) -> (i32, i32, i32, i32) {
    %c0_i32 = arith.constant 0 : i32
    %c0_i32_0 = arith.constant 0 : i32
    %c0_i32_1 = arith.constant 0 : i32
    return %arg0, %c0_i32, %arg1, %c0_i32_0 : i32, i32, i32, i32
  }
}

</mosaic_0001>

<bundles_post_ra>
// kernel: tpu_custom_call.1
= control target key start
LH: loop header
LB: loop body
LE: loop exit
PB: predicated region body
PF: predicated region fallthrough
CT: control target
= control target key end

     0   :  { %s5008_s0 = inlined_call_operand.hbm [shape: f32[2,16,16,128], index: 0, kind: input, shape index: {}]   ;;  %s5009_s1 = inlined_call_operand.hbm [shape: bf16[4,512,128], index: 1, kind: input, shape index: {}]   ;;  %s5010_s2 = inlined_call_operand.vmem [shape: f32[1,128], index: 2, kind: input, shape index: {}]   ;;  %s5011_s3 = inlined_call_operand.hbm [shape: f32[2,4,256,128], index: 3, kind: output, shape index: {}]  }
   0x1   :  { %5022 = sst [smem:[#allocation19_spill]] %s5009_s1 }
   0x2   :  { %8 = vsyncpa [#allocation4], 0 }
   0x3   :  { %10 = vsyncpa [#allocation4 + $0x1], 0 }
   0x4   :  { %11 = vsyncpa [#allocation7], 0 }
   0x5   :  { %12 = vsyncpa [#allocation5], 0 }
   0x6   :  { %14 = vsyncpa [#allocation5 + $0x1], 0  ;;  %s4076_s12 = smov 0   ;;  %s4078_s13 = smov 0  }
   0x7   :  { %s4080_s14 = smov 0   ;;  %s4082_s15 = smov 0  }
   0x8   :  { %s4084_s16 = smov 0   ;;  %s4086_s17 = smov 0  }
   0x9   :  { %s4088_s18 = smov 0   ;;  %s4090_s19 = smov 0  }
   0xa   :  { %s4092_s20 = smov 0   ;;  %s4094_s21 = smov 0  }
   0xb   :  { %s4096_s22 = smov 0  }
   0xc LB: > { %5023 = sst [smem:[#allocation14_spill]] %s4000_s12  ;;  %s2652_s23 = sadd.s32 4294967295, %s4040_s22   ;;  %s4040_s22 = sphi %s4096_s22, %s20_s22   ;;  %s4036_s21 = sphi %s4094_s21, %s5058_s21   ;;  %s4032_s20 = sphi %s4092_s20, %s5049_s20   ;;  %s4028_s19 = sphi %s4090_s19, %s5057_s19   ;;  %s4024_s18 = sphi %s4088_s18, %s5048_s18   ;;  %s4020_s17 = sphi %s4086_s17, %s5056_s17   ;;  %s4016_s16 = sphi %s4084_s16, %s5055_s16   ;;  %s4012_s15 = sphi %s4082_s15, %s5054_s15   ;;  %s4008_s14 = sphi %s4080_s14, %s5053_s14   ;;  %s4004_s13 = sphi %s4078_s13, %s5052_s13   ;;  %s4000_s12 = sphi %s4076_s12, %s5051_s12  }
   0xd   : > { %5024 = sst [smem:[#allocation15_spill]] %s4032_s20  ;;  %s2653_s24 = sadd.s32 4294967294, %s4040_s22  }
   0xe   : > { %p52_p0 = scmp.ne.s32.totalorder %s4016_s16, %s4012_s15  ;;  %p4132_p1 = scmp.eq.s32.totalorder %s2652_s23, 0 }
   0xf   : > { %s109_s26 = sadd.s32 1, %s4008_s14  ;;  %p119_p2 = scmp.ne.s32.totalorder %s4008_s14, %s4004_s13 }
  0x10   : > { %s5025_s25 = scalar_select %p4132_p1, 1, 0 }
  0x11   : > { %p4141_p3 = por %p4132_p1, %p52_p0  ;;  %p120_p4 = scmp.eq.s32.totalorder %s2652_s23, 3 }
  0x12   : > { %p125_p5 = scmp.ne.s32.totalorder %s4004_s13, %s4000_s12  ;;  %p126_p6 = scmp.eq.s32.totalorder %s2653_s24, 3 }
  0x13   : > { %s5026_s27 = scalar_select %p4141_p3, 1, 0 }
  0x14   : > { %p4147_p7 = por %p120_p4, %p119_p2  ;;  %p2654_p8 = scmp.ge.s32.totalorder %s4040_s22, 1 }
  0x15   : > { %p4152_p9 = por %p126_p6, %p125_p5  ;;  %p133_p10 = scmp.lt.s32.totalorder %s4040_s22, 5 }
  0x16   : > { %s5027_s28 = scalar_select %p4147_p7, 1, 0 }
  0x17   : > { %s5028_s29 = scalar_select %p4152_p9, 1, 0 }
  0x18   : > { %p4157_p11 = pnand %p2654_p8, %p133_p10  ;;  %s4042_s4 = smov [#allocation6]  }
  0x19   : > { %5029 = sst [smem:[#allocation16_spill]] %s5028_s29  ;;  %s145_s5 = sshll.u32 %s4042_s4, 4  ;;  %s146_s5 = int_to_ptr.vmem [resolvable:$true] %s145_s5 }
  0x1a   : > { %s5030_s30 = scalar_select %p4157_p11, 1, 0 }
  0x1b   : > { %p3636_p12 = pneg %p4157_p11  ;;  %s5032_s1 = sld [smem:[#allocation19_spill]] }
  0x1d   : > { %p4165_p13 = pnand %p3636_p12, %p4132_p1 }
  0x1f   : > { %p3886_p2 = pneg %p4165_p13 }
  0x21   : > { %s3884_s9 = scalar_lea.hbm %s5032_s1, 16384 }
  0x22   : > { %p3885_p0 = scmp.ne.s32.totalorder %s5032_s1, %s3884_s9  ;;  %p3891_p6 = scmp.lt.u32.totalorder %s3884_s9, %s5032_s1 }
  0x24   : > { %p3887_p4 = pnand %p3886_p2, %p3885_p0 }
  0x26   : > { %p3888_p5 = pneg %p3887_p4 }
  0x28   : > { %p3893_p8 = pnand %p3891_p6, %p3888_p5 }
  0x2a   : > { %3896 = shalt.err (!%p3893_p8)
}
  0x2b   : > { %s3897_s24 = scalar_lea.vmem %s146_s5, 16384  ;;  %p3905_p7 = scmp.lt.s32.totalorder %s146_s5, %s146_s5 }
  0x2c   : > { %p3898_p10 = scmp.ne.s32.totalorder %s146_s5, %s3897_s24  ;;  %p3906_p1 = scmp.lt.s32.totalorder %s3897_s24, %s3897_s24 }
  0x2e   : > { %p3900_p12 = pnand %p3898_p10, %p3886_p2  ;;  %p3907_p3 = por %p3906_p1, %p3905_p7 }
  0x30   : > { %p3901_p9 = pneg %p3900_p12 }
  0x32   : > { %p3908_p11 = pnand %p3907_p3, %p3901_p9 }
  0x34   : > { %3911 = shalt.err (!%p3908_p11)
}
  0x35   : > { %s4043_s4 = smov 64   ;;  %s4044_s7 = smov 4  }
  0x36   : > { %3639 = dma.hbm_to_vmem [thread:$0]  (!%p4165_p13), %s5032_s1, 16384, %s146_s5, [#allocation7], %s4043_s4, %s4043_s4, %s4044_s7  }
  0x37   : > { %s29_s10 = sadd.s32 1, %s4032_s20  ;;  %s32_s11 = sadd.s32 1, %s4036_s21 }
  0x38   : > { %p30_p1 = scmp.ge.s32.totalorder %s29_s10, 2  ;;  %s39_s15 = sadd.s32 1, %s4020_s17 }
  0x39   : > { %p46_p3 = scmp.ne.s32.totalorder %s4020_s17, %s4016_s16  ;;  %p47_p7 = scmp.eq.s32.totalorder %s4040_s22, 0 }
  0x3a   : > { %s5060_s10 = smov (%p30_p1, %s29_s10), 0  ;;  %s5062_s11 = smov (!%p30_p1, %s32_s11), %s4036_s21 }
  0x3b   : > { %5033 = sst [smem:[#allocation17_spill]] %s5060_s10  ;;  %s105_s6 = ssub.s32 %s4032_s20, %s5060_s10 }
  0x3c   : > { %p34_p9 = scmp.ge.s32.totalorder %s5062_s11, 2  ;;  %p3649_p11 = scmp.lt.s32.totalorder %s4040_s22, 4 }
  0x3d   : > { %p4197_p13 = por %p47_p7, %p46_p3  ;;  %s162_s23 = sand.u32 1, %s4020_s17  }
  0x3e   : > { %s5064_s11 = smov (%p34_p9, %s5062_s11), 0  ;;  %s2657_s24 = sshll.u32 %s162_s23, 8 }
  0x3f   : > { %5035 = sst [smem:[#allocation18_spill]] %s5064_s11  ;;  %s36_s4 = ssub.s32 %s4036_s21, %s5064_s11 }
  0x40   : > { %p37_p0 = scmp.eq.s32.totalorder %s36_s4, 0  ;;  %s106_s7 = sor.u32 %s105_s6, %s36_s4 }
  0x41   : > { %p107_p2 = scmp.eq.s32.totalorder %s106_s7, 0  ;;  %s2852_s8 = sshll.u32 %s4036_s21, 12 }
  0x42   : > { %s4208_s9 = scalar_select %p37_p0, %s4020_s17, %s39_s15  }
  0x43   : > { %s4213_s1 = scalar_select %p107_p2, %s4008_s14, %s109_s26  }
  0x44   : > { %s4218_s29 = scalar_lea.hbm %s5008_s0, %s2852_s8  ;;  %s166_s12 = scalar_lea.vmem [#allocation3], %s2657_s24 }
  0x45   : > { %s173_s11 = sshll.u32 %s166_s12, 4  ;;  %p4226_p4 = pnand %p3649_p11, %p4197_p13  ;;  %s4220_s11 = int_to_ptr.vmem [resolvable:$true] %s173_s11 }
  0x46   : > { %s4230_s26 = scalar_lea.sflag [#allocation4], %s162_s23  ;;  %s3912_s20 = scalar_lea.hbm %s4218_s29, 4096 }
  0x47   : > { %p3913_p5 = scmp.ne.s32.totalorder %s4218_s29, %s3912_s20  ;;  %p3914_p6 = pneg %p4226_p4 }
  0x48   : > { %s3917_s6 = scalar_lea.hbm %s5008_s0, 8192  ;;  %p3918_p12 = scmp.lt.u32.totalorder %s4218_s29, %s5008_s0 }
  0x49   : > { %p3915_p8 = pnand %p3914_p6, %p3913_p5  ;;  %p3919_p1 = scmp.lt.u32.totalorder %s3917_s6, %s3912_s20 }
  0x4a   : > { %p3921_p7 = scmp.lt.u32.totalorder %s3912_s20, %s4218_s29 }
  0x4b   : > { %p3916_p10 = pneg %p3915_p8  ;;  %p3920_p3 = por %p3919_p1, %p3918_p12 }
  0x4d   : > { %p3922_p9 = por %p3921_p7, %p3920_p3 }
  0x4f   : > { %p3923_p11 = pnand %p3922_p9, %p3916_p10 }
  0x51   : > { %3926 = shalt.err (!%p3923_p11)
}
  0x52   : > { %s3927_s23 = scalar_lea.vmem %s4220_s11, 4096  ;;  %s4045_s4 = smov [#allocation3]  }
  0x53   : > { %p3928_p13 = scmp.ne.s32.totalorder %s4220_s11, %s3927_s23  ;;  %s3932_s7 = sshll.u32 %s4045_s4, 4  ;;  %s3933_s7 = int_to_ptr.vmem [resolvable:$false] %s3932_s7 }
  0x54   : > { %s3934_s8 = scalar_lea.vmem %s3933_s7, 8192  ;;  %p3935_p5 = scmp.lt.s32.totalorder %s4220_s11, %s3933_s7 }
  0x55   : > { %p3930_p0 = pnand %p3928_p13, %p3914_p6  ;;  %p3936_p8 = scmp.lt.s32.totalorder %s3934_s8, %s3927_s23 }
  0x57   : > { %p3931_p2 = pneg %p3930_p0  ;;  %p3937_p12 = por %p3936_p8, %p3935_p5 }
  0x59   : > { %p3938_p1 = pnand %p3937_p12, %p3931_p2 }
  0x5b   : > { %3941 = shalt.err (!%p3938_p1)
}
  0x5c   : > { %s4046_s20 = smov 128   ;;  %s4047_s12 = smov 8  }
  0x5d   : > { %3643 = dma.hbm_to_vmem [thread:$0]  (!%p4226_p4), %s4218_s29, 4096, %s4220_s11, %s4230_s26, %s4046_s20, %s4046_s20, %s4047_s12  }
  0x5e   : > { %p5037_p6 = scmp.ne.s32.totalorder %s5030_s30, 0 }
  0x5f   : > { %s187_s10 = sand.u32 (!%p5037_p6), 1, %s4016_s16   ;;  %p5038_p10 = scmp.ne.s32.totalorder (!%p5037_p6), %s5026_s27, 0 }
  0x60   : > { %185 = sbr.rel (%p5037_p6) target bundleno = 623 (0x26f), region = 32  ;;  %s2661_s6 = sshll.u32 (!%p5037_p6), %s187_s10, 8 }
  0x61   : > { %s188_s5 = scalar_lea.sflag (!%p5037_p6), [#allocation4], %s187_s10  ;;  %s4261_s24 = scalar_lea.vmem (!%p5037_p6), [#allocation3], %s2661_s6 }
  0x67   : > { %3987 = dma.done.wait (%p5038_p10), %s188_s5, 4096  }
  0x68   : > { %3989 = vsyncadd (%p5038_p10), %s188_s5, 4294963200  ;;  %p5039_p3 = scmp.ne.s32.totalorder %s5025_s25, 0 }
  0x6a   : > { %3991 = dma.done.wait (%p5039_p3), [#allocation7], 16384  }
  0x6b   : > { %3993 = vsyncadd (%p5039_p3), [#allocation7], 4294950912  ;;  %v265_v0 = vlaneseq  ;;  %p228_p4 = scmp.gt.s32.totalorder %s4024_s18, 0  ;;  %v3755_v3 = vld [vmem:[#allocation6 + $0x40] sm:$0xff]   ;;  %v3759_v7 = vld [vmem:[#allocation6 + $0x48] sm:$0xff]   ;;  %s2664_s25 = sshll.u32 %s4024_s18, 3 }
  0x6c   : > { %v3756_v4 = vld [vmem:[#allocation6 + $0xc0] sm:$0xff]   ;;  %3110 = vmatprep.subr.bf16.mxu0 %v3755_v3  ;;  %v3760_v8 = vld [vmem:[#allocation6 + $0xc8] sm:$0xff]   ;;  %v3763_v11 = vld [vmem:[#allocation6 + $0x50] sm:$0xff]   ;;  %s2665_s27 = sadd.s32 4294967295, %s2664_s25  ;;  %s2853_s30 = sshll.u32 %s4024_s18, 7  ;;  %vm4048_vm2 = vmmov 1  }
  0x6d   : > { %v4272_v1 = vshrl.u32 %v265_v0, 7  ;;  %s4277_s29 = scalar_select %p228_p4, 1, 0  ;;  %v3757_v5 = vld [vmem:[#allocation6] sm:$0xff]   ;;  %3174 = vmatprep.subr.bf16.mxu1 %v3756_v4  ;;  %v3761_v9 = vld [vmem:[#allocation6 + $0x8] sm:$0xff]   ;;  %v3764_v12 = vld [vmem:[#allocation6 + $0xd0] sm:$0xff]  }
  0x6e   : > { %v3758_v6 = vld [vmem:[#allocation6 + $0x80] sm:$0xff]   ;;  %3111 = vmatpush3.bf16.msra.mxu0 %v3757_v5  ;;  %v3762_v10 = vld [vmem:[#allocation6 + $0x88] sm:$0xff]   ;;  %v3765_v13 = vld [vmem:[#allocation6 + $0x10] sm:$0xff]   ;;  %p222_p7 = scmp.gt.s32.totalorder %s2665_s27, 0  ;;  %s4286_s23 = scalar_lea.vmem %s4261_s24, %s2853_s30 [#allocation3] }
  0x6f   : > { %v4275_v2 = vadd.s32 8, %v4272_v1  ;;  %3175 = vmatpush3.bf16.msra.mxu1 %v3758_v6  ;;  %3112 = vmatprep.subr.bf16.mxu0 %v3759_v7  ;;  %v3766_v14 = vld [vmem:[#allocation6 + $0x90] sm:$0xff]   ;;  %v3767_v15 = vld [vmem:[#allocation6 + $0x58] sm:$0xff]   ;;  %v3771_v19 = vld [vmem:[#allocation6 + $0x60] sm:$0xff]   ;;  %s230_s15 = scvt.s32.f32 %s4277_s29  ;;  %vm3651_vm0 = vcmp.ne.s32.totalorder %v4272_v1, 0  ;;  %vm337_vm1 = vcmp.lt.s32.totalorder %v4272_v1, 1 }
  0x70   : > { %3176 = vmatprep.subr.bf16.mxu1 %v3760_v8  ;;  %v3768_v16 = vld [vmem:[#allocation6 + $0xd8] sm:$0xff]   ;;  %v3772_v20 = vld [vmem:[#allocation6 + $0xe0] sm:$0xff]   ;;  %v3775_v23 = vld [vmem:[#allocation6 + $0x68] sm:$0xff]   ;;  %s5066_s27 = smov (!%p222_p7, %s2665_s27), 0  ;;  %vm428_vm4 = vcmp.lt.s32.totalorder %v4272_v1, 7  ;;  %s252_s4 = sadd.s32 8, %s2664_s25 }
  0x71   : > { %v3769_v17 = vld [vmem:[#allocation6 + $0x18] sm:$0xff]   ;;  %v3773_v21 = vld [vmem:[#allocation6 + $0x20] sm:$0xff]   ;;  %v3776_v24 = vld [vmem:[#allocation6 + $0xe8] sm:$0xff]   ;;  %s2666_s11 = sshll.u32 %s5066_s27, 4  ;;  %v231_v34 = vstv %s230_s15  ;;  %vm3652_vm5 = vcmp.ne.s32.totalorder %v4275_v2, 15  ;;  %p253_p9 = scmp.lt.s32.totalorder %s252_s4, 15 }
  0x72   : > { %3113 = vmatpush3.bf16.msra.mxu0 %v3761_v9  ;;  %v3770_v18 = vld [vmem:[#allocation6 + $0x98] sm:$0xff]   ;;  %v3774_v22 = vld [vmem:[#allocation6 + $0xa0] sm:$0xff]   ;;  %v3777_v25 = vld [vmem:[#allocation6 + $0x28] sm:$0xff]   ;;  %s225_s26 = scalar_lea.vmem %s4261_s24, %s2666_s11 [#allocation3]  ;;  %p259_p11 = scmp.lt.s32.totalorder %s4024_s18, 1 }
  0x73   : > { %3177 = vmatpush3.bf16.msra.mxu1 %v3762_v10  ;;  %3114 = vmatprep.subr.bf16.mxu0 %v3763_v11  ;;  %v3778_v26 = vld [vmem:[#allocation6 + $0xa8] sm:$0xff]   ;;  %v3779_v27 = vld [vmem:[#allocation6 + $0x70] sm:$0xff]   ;;  %v3783_v31 = vld [vmem:[#allocation6 + $0x78] sm:$0xff]   ;;  %s5068_s4 = smov (!%p253_p9, %s252_s4), 15  ;;  %s215_s10 = sand.u32 1, %s4004_s13  }
  0x74   : > { %3178 = vmatprep.subr.bf16.mxu1 %v3764_v12  ;;  %v3780_v28 = vld [vmem:[#allocation6 + $0xf0] sm:$0xff]   ;;  %v3784_v32 = vld [vmem:[#allocation6 + $0xf8] sm:$0xff]   ;;  %v226_v36 = vld [vmem:[%s225_s26] sm:$0xff]  ;;  %s260_s7 = scalar_select %p259_p11, 1, 0 }
  0x75   : > { %v3781_v29 = vld [vmem:[#allocation6 + $0x30] sm:$0xff]   ;;  %v3785_v33 = vld [vmem:[#allocation6 + $0x38] sm:$0xff]   ;;  %v227_v37 = vld [vmem:[%s225_s26 + $0x8] sm:$0xff]  ;;  %v4292_v39 = vmul.f32 %v231_v34, %v226_v36  ;;  %s2668_s8 = sshll.u32 %s5068_s4, 4  ;;  %s2505_s30 = scalar_lea.sflag [#allocation5], %s215_s10 }
  0x76   : > { %3115 = vmatpush3.bf16.msra.mxu0 %v3765_v13  ;;  %v3782_v30 = vld [vmem:[#allocation6 + $0xb0] sm:$0xff]   ;;  %v3786_v35 = vld [vmem:[#allocation6 + $0xb8] sm:$0xff]   ;;  %v4289_v38 = vld [vmem:[%s4286_s23] sm:$0xff]  ;;  %v4294_v40 = vmul.f32 %v231_v34, %v227_v37  ;;  %s261_s20 = scvt.s32.f32 %s260_s7  ;;  %s256_s12 = scalar_lea.vmem %s4261_s24, %s2668_s8 [#allocation3] }
  0x77   : > { %3179 = vmatpush3.bf16.msra.mxu1 %v3766_v14  ;;  %3116 = vmatprep.subr.bf16.mxu0 %v3767_v15  ;;  %v4297_v41 = vld [vmem:[%s4286_s23 + $0x8] sm:$0xff]  ;;  %v318_v42 = vrot.slane %v4289_v38, 7  ;;  %v3787_v45 = vld [vmem:[#allocation6 + $0x140] sm:$0xff]   ;;  %v317_v47 = vrot.slane %v4292_v39, 7  ;;  %vm4313_vm3 = vmpackc.low %vm4048_vm2, %vm3651_vm0  ;;  %s2663_s24 = sshll.u32 %s215_s10, 9 }
  0x78   : > { %3180 = vmatprep.subr.bf16.mxu1 %v3768_v16  ;;  %v4303_v43 = vpack.c.bf16 %v4297_v41, %v4289_v38  ;;  %v328_v44 = vrot.slane %v4297_v41, 7  ;;  %v4308_v46 = vpack.c.bf16 %v4294_v40, %v4292_v39  ;;  %v327_v48 = vrot.slane %v4294_v40, 7  ;;  %v3788_v50 = vld [vmem:[#allocation6 + $0x100] sm:$0xff]   ;;  %v4330_v59 = vld [vmem:[%s4286_s23 + $0x10] sm:$0xff]  ;;  %v4333_v60 = vld [vmem:[%s4286_s23 + $0x18] sm:$0xff]  ;;  %s4785_s29 = scalar_lea.vmem [#allocation8], %s2663_s24 }
  0x79   : > { %v3789_v53 = vld [vmem:[#allocation6 + $0x1c0] sm:$0xff]   ;;  %v4340_v61 = vpack.c.bf16 %v4333_v60, %v4330_v59  ;;  %v319_v62 = vrot.slane %v4330_v59, 7  ;;  %v329_v63 = vrot.slane %v4333_v60, 7  ;;  %v3791_v0 = vld [vmem:[#allocation6 + $0x148] sm:$0xff]   ;;  %v3795_v14 = vld [vmem:[#allocation6 + $0x150] sm:$0xff]   ;;  %v410_v2 = vrot.slane %v4330_v59, 1 }
  0x7a   : > { %3117 = vmatpush3.bf16.msra.mxu0 %v3769_v17  ;;  %921 = vmatprep.mubr.bf16.mxu1 %v4303_v43  ;;  %v339_v51 = vsel %vm337_vm1, %v318_v42, %v328_v44  ;;  %v349_v52 = vsel %vm337_vm1, %v328_v44, %v318_v42  ;;  %v338_v54 = vsel %vm337_vm1, %v317_v47, %v327_v48  ;;  %v3790_v57 = vld [vmem:[#allocation6 + $0x180] sm:$0xff]   ;;  %v3792_v3 = vld [vmem:[#allocation6 + $0x108] sm:$0xff]   ;;  %v3796_v15 = vld [vmem:[#allocation6 + $0x110] sm:$0xff]  }
  0x7b   : > { %3181 = vmatpush3.bf16.msra.mxu1 %v3770_v18  ;;  %3118 = vmatprep.subr.bf16.mxu0 %v3771_v19  ;;  %v348_v55 = vsel %vm337_vm1, %v327_v48, %v317_v47  ;;  %v4327_v56 = vpack.c.bf16 %v339_v51, %v349_v52  ;;  %v340_v4 = vsel %vm337_vm1, %v319_v62, %v329_v63  ;;  %v3793_v6 = vld [vmem:[#allocation6 + $0x1c8] sm:$0xff]   ;;  %v4353_v8 = vld [vmem:[%s4286_s23 + $0x20] sm:$0xff]  ;;  %v3797_v16 = vld [vmem:[#allocation6 + $0x1d0] sm:$0xff]  }
  0x7c   : > { %3182 = vmatprep.subr.bf16.mxu1 %v3772_v20  ;;  %824 = vmatprep.mubr.bf16.mxu0 %v4308_v46  ;;  %v2856_v58 = vpack.c.bf16 %v338_v54, %v348_v55  ;;  %v350_v5 = vsel %vm337_vm1, %v329_v63, %v319_v62  ;;  %v3794_v7 = vld [vmem:[#allocation6 + $0x188] sm:$0xff]   ;;  %v320_v11 = vrot.slane %v4353_v8, 7  ;;  %v3798_v17 = vld [vmem:[#allocation6 + $0x190] sm:$0xff]   ;;  %v3806_v37 = vld [vmem:[#allocation6 + $0x1a0] sm:$0xff]  }
  0x7d   : > { %v4355_v9 = vpack.c.bf16 %v340_v4, %v350_v5  ;;  %v4358_v10 = vld [vmem:[%s4286_s23 + $0x28] sm:$0xff]  ;;  %v4370_v18 = vld [vmem:[%s4286_s23 + $0x30] sm:$0xff]  ;;  %v4425_v54 = vld [vmem:[%s4286_s23 + $0x58] sm:$0xff] }
  0x7e   : > { %3119 = vmatpush3.bf16.msra.mxu0 %v3773_v21  ;;  %v4363_v12 = vpack.c.bf16 %v4358_v10, %v4353_v8  ;;  %v330_v13 = vrot.slane %v4358_v10, 7  ;;  %v4381_v21 = vld [vmem:[%s4286_s23 + $0x38] sm:$0xff]  ;;  %v4408_v36 = vld [vmem:[%s4286_s23 + $0x48] sm:$0xff]  ;;  %v3812_v62 = vld [vmem:[#allocation6 + $0x130] sm:$0xff]  }
  0x7f   : > { %3183 = vmatpush3.bf16.msra.mxu1 %v3774_v22  ;;  %3120 = vmatprep.subr.bf16.mxu0 %v3775_v23  ;;  %v3799_v22 = vld [vmem:[#allocation6 + $0x158] sm:$0xff]   ;;  %v332_v48 = vrot.slane %v4408_v36, 7  ;;  %v3809_v51 = vld [vmem:[#allocation6 + $0x1e8] sm:$0xff]   ;;  %v3813_v63 = vld [vmem:[#allocation6 + $0x1f0] sm:$0xff]  }
  0x80   : > { %3184 = vmatprep.subr.bf16.mxu1 %v3776_v24  ;;  %v341_v19 = vsel %vm337_vm1, %v320_v11, %v330_v13  ;;  %v351_v20 = vsel %vm337_vm1, %v330_v13, %v320_v11  ;;  %v3800_v23 = vld [vmem:[#allocation6 + $0x118] sm:$0xff]   ;;  %v3810_v52 = vld [vmem:[#allocation6 + $0x1a8] sm:$0xff]   ;;  %v4448_v13 = vld [vmem:[%s4286_s23 + $0x60] sm:$0xff] }
  0x81   : > { %v4384_v24 = vpack.c.bf16 %v341_v19, %v351_v20  ;;  %v3816_v11 = vld [vmem:[#allocation6 + $0x138] sm:$0xff]   ;;  %v3819_v20 = vld [vmem:[#allocation6 + $0x240] sm:$0xff]   ;;  %vm4527_vm6 = vmpackc.low %vm3652_vm5, %vm4048_vm2 }
  0x82   : > { %3121 = vmatpush3.bf16.msra.mxu0 %v3777_v25  ;;  %v3801_v25 = vld [vmem:[#allocation6 + $0x1d8] sm:$0xff]   ;;  %v3822_v59 = vld [vmem:[#allocation6 + $0x280] sm:$0xff]  }
  0x83   : > { %3185 = vmatpush3.bf16.msra.mxu1 %v3778_v26  ;;  %3122 = vmatprep.subr.bf16.mxu0 %v3779_v27  ;;  %v4388_v26 = vpack.c.bf16 %v4381_v21, %v4370_v18  ;;  %v321_v27 = vrot.slane %v4370_v18, 7  ;;  %v3818_v19 = vld [vmem:[#allocation6 + $0x1b8] sm:$0xff]  }
  0x84   : > { %3186 = vmatprep.subr.bf16.mxu1 %v3780_v28  ;;  %v331_v28 = vrot.slane %v4381_v21, 7 }
  0x86   : > { %3123 = vmatpush3.bf16.msra.mxu0 %v3781_v29  ;;  %v3802_v29 = vld [vmem:[#allocation6 + $0x198] sm:$0xff]   ;;  %v352_v34 = vsel %vm337_vm1, %v331_v28, %v321_v27 }
  0x87   : > { %3187 = vmatpush3.bf16.msra.mxu1 %v3782_v30  ;;  %3124 = vmatprep.subr.bf16.mxu0 %v3783_v31  ;;  %v4393_v30 = vld [vmem:[%s4286_s23 + $0x40] sm:$0xff] }
  0x88   : > { %3188 = vmatprep.subr.bf16.mxu1 %v3784_v32  ;;  %v3803_v31 = vld [vmem:[#allocation6 + $0x160] sm:$0xff]   ;;  %v322_v44 = vrot.slane %v4393_v30, 7  ;;  %v4415_v47 = vpack.c.bf16 %v4408_v36, %v4393_v30 }
  0x89   : > { %v3804_v32 = vld [vmem:[#allocation6 + $0x120] sm:$0xff]  }
  0x8a   : > { %3125 = vmatpush3.bf16.msra.mxu0 %v3785_v33  ;;  %v342_v33 = vsel %vm337_vm1, %v321_v27, %v331_v28  ;;  %v343_v55 = vsel %vm337_vm1, %v322_v44, %v332_v48  ;;  %v324_v27 = vrot.slane %v4448_v13, 7 }
  0x8b   : > { %3189 = vmatpush3.bf16.msra.mxu1 %v3786_v35  ;;  %3238 = vmatprep.subr.bf16.mxu0 %v3787_v45  ;;  %v3805_v35 = vld [vmem:[#allocation6 + $0x1e0] sm:$0xff]   ;;  %v4410_v42 = vpack.c.bf16 %v342_v33, %v352_v34  ;;  %v3807_v45 = vld [vmem:[#allocation6 + $0x168] sm:$0xff]   ;;  %v4486_v33 = vld [vmem:[%s4286_s23 + $0x78] sm:$0xff] }
  0x8c   : > { %3302 = vmatprep.subr.bf16.mxu1 %v3789_v53  ;;  %v4422_v53 = vld [vmem:[%s4286_s23 + $0x50] sm:$0xff] }
  0x8d   : > { %2857 = vmatmul.mubr.msk.bf16.vlgmr.msra.gmra.mrb[0].mxu0 %vm4313_vm3, %v2856_v58  ;;  %v3811_v58 = vld [vmem:[#allocation6 + $0x170] sm:$0xff]   ;;  %v4440_v4 = vpack.c.bf16 %v4425_v54, %v4422_v53  ;;  %v323_v5 = vrot.slane %v4422_v53, 7 }
  0x8e   : > { %2889 = vmatmul.mubr.msk.bf16.vlgmr.msra.gmra.mrb[0].mxu1 %vm4313_vm3, %v4327_v56  ;;  %3239 = vmatpush3.bf16.msra.mxu0 %v3788_v50  ;;  %v3808_v50 = vld [vmem:[#allocation6 + $0x128] sm:$0xff]  }
  0x8f   : > { %3303 = vmatpush3.bf16.msra.mxu1 %v3790_v57  ;;  %832 = vmatprep.mubr.bf16.mxu0 %v4303_v43  ;;  %v353_v57 = vsel %vm337_vm1, %v332_v48, %v322_v44  ;;  %v335_v44 = vrot.slane %v4486_v33, 7  ;;  %v419_v48 = vrot.slane %v4297_v41, 1 }
  0x90   : > { %929 = vmatprep.mubr.bf16.mxu1 %v4340_v61  ;;  %3240 = vmatprep.subr.bf16.mxu0 %v3791_v0  ;;  %v4436_v0 = vpack.c.bf16 %v343_v55, %v353_v57 }
  0x91   : > { %3304 = vmatprep.subr.bf16.mxu1 %v3793_v6  ;;  %v333_v6 = vrot.slane %v4425_v54, 7 }
  0x92   : > { %3241 = vmatpush3.bf16.msra.mxu0 %v3792_v3  ;;  %v3814_v3 = vld [vmem:[#allocation6 + $0x1b0] sm:$0xff]  }
  0x93   : > { %3305 = vmatpush3.bf16.msra.mxu1 %v3794_v7  ;;  %3242 = vmatprep.subr.bf16.mxu0 %v3795_v14  ;;  %v3815_v7 = vld [vmem:[#allocation6 + $0x178] sm:$0xff]   ;;  %v4451_v14 = vld [vmem:[%s4286_s23 + $0x68] sm:$0xff] }
  0x94   : > { %3306 = vmatprep.subr.bf16.mxu1 %v3797_v16  ;;  %v344_v16 = vsel %vm337_vm1, %v323_v5, %v333_v6  ;;  %v334_v28 = vrot.slane %v4451_v14, 7 }
  0x95   : > { %2861 = vmatmul.mubr.msk.bf16.gmra.mrb[4].mxu0 %vm4313_vm3, %v4327_v56 }
  0x96   : > { %2893 = vmatmul.mubr.msk.bf16.gmra.mrb[4].mxu1 %vm4313_vm3, %v4355_v9  ;;  %840 = vmatprep.mubr.bf16.mxu0 %v4340_v61 }
  0x97   : > { %937 = vmatprep.mubr.bf16.mxu1 %v4363_v12  ;;  %3243 = vmatpush3.bf16.msra.mxu0 %v3796_v15  ;;  %v3817_v15 = vld [vmem:[#allocation6 + $0x1f8] sm:$0xff]  }
  0x98   : > { %3307 = vmatpush3.bf16.msra.mxu1 %v3798_v17  ;;  %3244 = vmatprep.subr.bf16.mxu0 %v3799_v22  ;;  %v354_v17 = vsel %vm337_vm1, %v333_v6, %v323_v5 }
  0x99   : > { %3308 = vmatprep.subr.bf16.mxu1 %v3801_v25  ;;  %v4462_v22 = vpack.c.bf16 %v344_v16, %v354_v17  ;;  %v4466_v25 = vpack.c.bf16 %v4451_v14, %v4448_v13  ;;  %v3823_v16 = vld [vmem:[#allocation6 + $0x248] sm:$0xff]  }
  0x9a   : > { %v3824_v17 = vld [vmem:[#allocation6 + $0x208] sm:$0xff]  }
  0x9b   : > { %3245 = vmatpush3.bf16.msra.mxu0 %v3800_v23  ;;  %v3821_v23 = vld [vmem:[#allocation6 + $0x2c0] sm:$0xff]  }
  0x9c   : > { %3309 = vmatpush3.bf16.msra.mxu1 %v3802_v29  ;;  %3246 = vmatprep.subr.bf16.mxu0 %v3803_v31  ;;  %v345_v29 = vsel %vm337_vm1, %v324_v27, %v334_v28  ;;  %v355_v31 = vsel %vm337_vm1, %v334_v28, %v324_v27  ;;  %v3828_v28 = vld [vmem:[#allocation6 + $0x210] sm:$0xff]  }
  0x9d   : > { %2865 = vmatmul.mubr.msk.bf16.gmra.mrb[8].mxu0 %vm4313_vm3, %v4355_v9  ;;  %3310 = vmatprep.subr.bf16.mxu1 %v3805_v35  ;;  %v4488_v34 = vpack.c.bf16 %v345_v29, %v355_v31  ;;  %v412_v29 = vrot.slane %v4370_v18, 1  ;;  %v3830_v31 = vld [vmem:[#allocation6 + $0x290] sm:$0xff]  }
  0x9e   : > { %2897 = vmatmul.mubr.msk.bf16.gmra.mrb[8].mxu1 %vm4313_vm3, %v4384_v24  ;;  %848 = vmatprep.mubr.bf16.mxu0 %v4363_v12 }
  0x9f   : > { %945 = vmatprep.mubr.bf16.mxu1 %v4388_v26  ;;  %3247 = vmatpush3.bf16.msra.mxu0 %v3804_v32  ;;  %v4482_v32 = vld [vmem:[%s4286_s23 + $0x70] sm:$0xff] }
  0xa0   : > { %3311 = vmatpush3.bf16.msra.mxu1 %v3806_v37  ;;  %3248 = vmatprep.subr.bf16.mxu0 %v3807_v45  ;;  %v4493_v35 = vpack.c.bf16 %v4486_v33, %v4482_v32  ;;  %v325_v37 = vrot.slane %v4482_v32, 7  ;;  %v409_v45 = vrot.slane %v4289_v38, 1 }
  0xa1   : > { %3312 = vmatprep.subr.bf16.mxu1 %v3809_v51  ;;  %v418_v51 = vrot.slane %v4294_v40, 1 }
  0xa2   : > { %v356_v38 = vsel %vm337_vm1, %v335_v44, %v325_v37  ;;  %v440_v40 = vsel %vm428_vm4, %v419_v48, %v409_v45 }
  0xa3   : > { %3249 = vmatpush3.bf16.msra.mxu0 %v3808_v50  ;;  %v408_v50 = vrot.slane %v4292_v39, 1  ;;  %v430_v39 = vsel %vm428_vm4, %v409_v45, %v419_v48  ;;  %v3833_v45 = vld [vmem:[#allocation6 + $0x2d8] sm:$0xff]  }
  0xa4   : > { %3313 = vmatpush3.bf16.msra.mxu1 %v3810_v52  ;;  %3250 = vmatprep.subr.bf16.mxu0 %v3811_v58  ;;  %v346_v52 = vsel %vm337_vm1, %v325_v37, %v335_v44  ;;  %v4524_v58 = vpack.c.bf16 %v440_v40, %v430_v39  ;;  %v422_v37 = vrot.slane %v4381_v21, 1  ;;  %v3831_v44 = vld [vmem:[#allocation6 + $0x258] sm:$0xff]   ;;  %v413_v39 = vrot.slane %v4393_v30, 1  ;;  %v3836_v40 = vld [vmem:[#allocation6 + $0x220] sm:$0xff]  }
  0xa5   : > { %2869 = vmatmul.mubr.msk.bf16.gmra.mrb[12].mxu0 %vm4313_vm3, %v4384_v24  ;;  %3314 = vmatprep.subr.bf16.mxu1 %v3813_v63  ;;  %v429_v41 = vsel %vm428_vm4, %v408_v50, %v418_v51  ;;  %v439_v55 = vsel %vm428_vm4, %v418_v51, %v408_v50  ;;  %v4522_v57 = vpack.c.bf16 %v346_v52, %v356_v38  ;;  %v3832_v48 = vld [vmem:[#allocation6 + $0x218] sm:$0xff]   ;;  %v3835_v51 = vld [vmem:[#allocation6 + $0x260] sm:$0xff]  }
  0xa6   : > { %2901 = vmatmul.mubr.msk.bf16.gmra.mrb[12].mxu1 %vm4313_vm3, %v4410_v42  ;;  %856 = vmatprep.mubr.bf16.mxu0 %v4388_v26  ;;  %v2920_v63 = vpack.c.bf16 %v439_v55, %v429_v41  ;;  %v433_v18 = vsel %vm428_vm4, %v412_v29, %v422_v37  ;;  %v443_v21 = vsel %vm428_vm4, %v422_v37, %v412_v29  ;;  %v3834_v50 = vld [vmem:[#allocation6 + $0x298] sm:$0xff]   ;;  %v3837_v52 = vld [vmem:[#allocation6 + $0x2e0] sm:$0xff]   ;;  %v423_v41 = vrot.slane %v4408_v36, 1 }
  0xa7   : > { %953 = vmatprep.mubr.bf16.mxu1 %v4415_v47  ;;  %3251 = vmatpush3.bf16.msra.mxu0 %v3812_v62  ;;  %v4580_v38 = vpack.c.bf16 %v443_v21, %v433_v18  ;;  %v3838_v55 = vld [vmem:[#allocation6 + $0x2a0] sm:$0xff]   ;;  %v415_v29 = vrot.slane %v4448_v13, 1 }
  0xa8   : > { %3315 = vmatpush3.bf16.msra.mxu1 %v3814_v3  ;;  %3252 = vmatprep.subr.bf16.mxu0 %v3815_v7  ;;  %v420_v3 = vrot.slane %v4333_v60, 1  ;;  %v411_v60 = vrot.slane %v4353_v8, 1  ;;  %v3820_v7 = vld [vmem:[#allocation6 + $0x200] sm:$0xff]   ;;  %v434_v30 = vsel %vm428_vm4, %v413_v39, %v423_v41  ;;  %v444_v36 = vsel %vm428_vm4, %v423_v41, %v413_v39  ;;  %v3856_v39 = vld [vmem:[#allocation6 + $0x308] sm:$0xff]   ;;  %v3859_v41 = vld [vmem:[#allocation6 + $0x350] sm:$0xff]  }
  0xa9   : > { %3316 = vmatprep.subr.bf16.mxu1 %v3817_v15  ;;  %v3852_v21 = vld [vmem:[#allocation6 + $0x300] sm:$0xff]  }
  0xaa   : > { %v431_v5 = vsel %vm428_vm4, %v410_v2, %v420_v3  ;;  %v441_v6 = vsel %vm428_vm4, %v420_v3, %v410_v2  ;;  %v3841_v2 = vld [vmem:[#allocation6 + $0x2e8] sm:$0xff]  }
  0xab   : > { %3253 = vmatpush3.bf16.msra.mxu0 %v3816_v11  ;;  %v421_v11 = vrot.slane %v4358_v10, 1  ;;  %v4550_v15 = vpack.c.bf16 %v441_v6, %v431_v5  ;;  %v3840_v3 = vld [vmem:[#allocation6 + $0x228] sm:$0xff]   ;;  %v3843_v6 = vld [vmem:[#allocation6 + $0x270] sm:$0xff]  }
  0xac   : > { %3317 = vmatpush3.bf16.msra.mxu1 %v3818_v19  ;;  %3366 = vmatprep.subr.bf16.mxu0 %v3819_v20  ;;  %v3825_v19 = vld [vmem:[#allocation6 + $0x2c8] sm:$0xff]  }
  0xad   : > { %2873 = vmatmul.mubr.msk.bf16.gmra.mrb[16].mxu0 %vm4313_vm3, %v4410_v42  ;;  %3430 = vmatprep.subr.bf16.mxu1 %v3821_v23  ;;  %v3826_v20 = vld [vmem:[#allocation6 + $0x288] sm:$0xff]   ;;  %v432_v8 = vsel %vm428_vm4, %v411_v60, %v421_v11  ;;  %v442_v10 = vsel %vm428_vm4, %v421_v11, %v411_v60  ;;  %v3829_v23 = vld [vmem:[#allocation6 + $0x2d0] sm:$0xff]   ;;  %v4596_v60 = vpack.c.bf16 %v444_v36, %v434_v30  ;;  %v3866_v30 = vld [vmem:[#allocation6 + $0x398] sm:$0xff]  }
  0xae   : > { %2905 = vmatmul.mubr.msk.bf16.gmra.mrb[16].mxu1 %vm4313_vm3, %v4436_v0  ;;  %864 = vmatprep.mubr.bf16.mxu0 %v4415_v47  ;;  %v4564_v27 = vpack.c.bf16 %v442_v10, %v432_v8  ;;  %v3842_v5 = vld [vmem:[#allocation6 + $0x2a8] sm:$0xff]   ;;  %v3844_v11 = vld [vmem:[#allocation6 + $0x230] sm:$0xff]   ;;  %v3848_v8 = vld [vmem:[#allocation6 + $0x238] sm:$0xff]  }
  0xaf   : > { %961 = vmatprep.mubr.bf16.mxu1 %v4440_v4  ;;  %v3850_v10 = vld [vmem:[#allocation6 + $0x2b8] sm:$0xff]   ;;  %v3867_v36 = vld [vmem:[#allocation6 + $0x360] sm:$0xff]  }
  0xb5   : > { %2877 = vmatmul.mubr.msk.bf16.gmra.mrb[20].mxu0 %vm4313_vm3, %v4436_v0 }
  0xb6   : > { %2909 = vmatmul.mubr.msk.bf16.gmra.mrb[20].mxu1 %vm4313_vm3, %v4462_v22  ;;  %872 = vmatprep.mubr.bf16.mxu0 %v4440_v4 }
  0xb7   : > { %969 = vmatprep.mubr.bf16.mxu1 %v4466_v25 }
  0xbd   : > { %2881 = vmatmul.mubr.msk.bf16.gmra.mrb[24].mxu0 %vm4313_vm3, %v4462_v22 }
  0xbe   : > { %2913 = vmatmul.mubr.msk.bf16.gmra.mrb[24].mxu1 %vm4313_vm3, %v4488_v34  ;;  %880 = vmatprep.mubr.bf16.mxu0 %v4466_v25 }
  0xbf   : > { %977 = vmatprep.mubr.bf16.mxu1 %v4493_v35 }
  0xc5   : > { %2885 = vmatmul.mubr.msk.bf16.gmra.mrb[28].mxu0 %vm4313_vm3, %v4488_v34 }
  0xc6   : > { %2917 = vmatmul.mubr.msk.bf16.gmra.mrb[28].mxu1 %vm4313_vm3, %v4522_v57  ;;  %2921 = vmatprep.mubr.msk.bf16.mxu0 %vm4527_vm6, %v2920_v63  ;;  %v3839_v63 = vld [vmem:[#allocation6 + $0x268] sm:$0xff]  }
  0xc7   : > { %2953 = vmatprep.mubr.msk.bf16.mxu1 %vm4527_vm6, %v4524_v58 }
  0xcd   : > { %1324 = vmatmul.mubr.bf16.vlgmr.msra.gmra.mrb[32].mxu0 %v4308_v46  ;;  %v3827_v46 = vld [vmem:[#allocation6 + $0x250] sm:$0xff]  }
  0xce   : > { %1421 = vmatmul.mubr.bf16.vlgmr.msra.gmra.mrb[32].mxu1 %v4303_v43  ;;  %3367 = vmatpush3.bf16.msra.mxu0 %v3820_v7  ;;  %v414_v7 = vrot.slane %v4422_v53, 1 }
  0xcf   : > { %3431 = vmatpush3.bf16.msra.mxu1 %v3822_v59  ;;  %2925 = vmatprep.mubr.msk.bf16.mxu0 %vm4527_vm6, %v4524_v58  ;;  %v3845_v59 = vld [vmem:[#allocation6 + $0x2f0] sm:$0xff]  }
  0xd0   : > { %2957 = vmatprep.mubr.msk.bf16.mxu1 %vm4527_vm6, %v4550_v15  ;;  %3368 = vmatprep.subr.bf16.mxu0 %v3823_v16  ;;  %v424_v16 = vrot.slane %v4425_v54, 1 }
  0xd1   : > { %3432 = vmatprep.subr.bf16.mxu1 %v3825_v19  ;;  %v3847_v19 = vld [vmem:[#allocation6 + $0x278] sm:$0xff]  }
  0xd2   : > { %3369 = vmatpush3.bf16.msra.mxu0 %v3824_v17  ;;  %v3846_v17 = vld [vmem:[#allocation6 + $0x2b0] sm:$0xff]   ;;  %v435_v53 = vsel %vm428_vm4, %v414_v7, %v424_v16  ;;  %v445_v54 = vsel %vm428_vm4, %v424_v16, %v414_v7  ;;  %v3871_v7 = vld [vmem:[#allocation6 + $0x368] sm:$0xff]  }
  0xd3   : > { %3433 = vmatpush3.bf16.msra.mxu1 %v3826_v20  ;;  %3370 = vmatprep.subr.bf16.mxu0 %v3827_v46  ;;  %v3849_v20 = vld [vmem:[#allocation6 + $0x2f8] sm:$0xff]   ;;  %v3853_v46 = vld [vmem:[#allocation6 + $0x3c0] sm:$0xff]   ;;  %v3874_v16 = vld [vmem:[#allocation6 + $0x3a8] sm:$0xff]  }
  0xd4   : > { %3434 = vmatprep.subr.bf16.mxu1 %v3829_v23  ;;  %v3851_v23 = vld [vmem:[#allocation6 + $0x340] sm:$0xff]  }
  0xd5   : > { %1332 = vmatmul.mubr.bf16.gmra.mrb[36].mxu0 %v4303_v43 }
  0xd6   : > { %1429 = vmatmul.mubr.bf16.gmra.mrb[36].mxu1 %v4340_v61  ;;  %2929 = vmatprep.mubr.msk.bf16.mxu0 %vm4527_vm6, %v4550_v15 }
  0xd7   : > { %2961 = vmatprep.mubr.msk.bf16.mxu1 %vm4527_vm6, %v4564_v27  ;;  %3371 = vmatpush3.bf16.msra.mxu0 %v3828_v28  ;;  %v4612_v28 = vpack.c.bf16 %v445_v54, %v435_v53  ;;  %v3881_v53 = vld [vmem:[#allocation6 + $0x3f8] sm:$0xff]  }
  0xd8   : > { %3435 = vmatpush3.bf16.msra.mxu1 %v3830_v31  ;;  %3372 = vmatprep.subr.bf16.mxu0 %v3831_v44  ;;  %v425_v31 = vrot.slane %v4451_v14, 1  ;;  %v416_v44 = vrot.slane %v4482_v32, 1  ;;  %v3880_v54 = vld [vmem:[#allocation6 + $0x338] sm:$0xff]  }
  0xd9   : > { %3436 = vmatprep.subr.bf16.mxu1 %v3833_v45  ;;  %v426_v45 = vrot.slane %v4486_v33, 1  ;;  %v3854_v33 = vld [vmem:[#allocation6 + $0x380] sm:$0xff]  }
  0xda   : > { %v436_v13 = vsel %vm428_vm4, %v415_v29, %v425_v31  ;;  %v446_v14 = vsel %vm428_vm4, %v425_v31, %v415_v29 }
  0xdb   : > { %3373 = vmatpush3.bf16.msra.mxu0 %v3832_v48  ;;  %v4628_v37 = vpack.c.bf16 %v446_v14, %v436_v13  ;;  %v437_v48 = vsel %vm428_vm4, %v416_v44, %v426_v45  ;;  %v447_v32 = vsel %vm428_vm4, %v426_v45, %v416_v44 }
  0xdc   : > { %3437 = vmatpush3.bf16.msra.mxu1 %v3834_v50  ;;  %3374 = vmatprep.subr.bf16.mxu0 %v3835_v51  ;;  %v4644_v18 = vpack.c.bf16 %v447_v32, %v437_v48  ;;  %v3855_v50 = vld [vmem:[#allocation6 + $0x348] sm:$0xff]  }
  0xdd   : > { %3438 = vmatprep.subr.bf16.mxu1 %v3837_v52  ;;  %1340 = vmatmul.mubr.bf16.gmra.mrb[40].mxu0 %v4340_v61  ;;  %v3857_v51 = vld [vmem:[#allocation6 + $0x3c8] sm:$0xff]  }
  0xde   : > { %1437 = vmatmul.mubr.bf16.gmra.mrb[40].mxu1 %v4363_v12  ;;  %2933 = vmatprep.mubr.msk.bf16.mxu0 %vm4527_vm6, %v4564_v27  ;;  %v3858_v52 = vld [vmem:[#allocation6 + $0x388] sm:$0xff]  }
  0xdf   : > { %2965 = vmatprep.mubr.msk.bf16.mxu1 %vm4527_vm6, %v4580_v38  ;;  %3375 = vmatpush3.bf16.msra.mxu0 %v3836_v40  ;;  %v3861_v40 = vld [vmem:[#allocation6 + $0x3d0] sm:$0xff]  }
  0xe0   : > { %3439 = vmatpush3.bf16.msra.mxu1 %v3838_v55  ;;  %3376 = vmatprep.subr.bf16.mxu0 %v3839_v63  ;;  %v3860_v55 = vld [vmem:[#allocation6 + $0x310] sm:$0xff]  }
  0xe1   : > { %3440 = vmatprep.subr.bf16.mxu1 %v3841_v2  ;;  %v3862_v63 = vld [vmem:[#allocation6 + $0x390] sm:$0xff]   ;;  %v3863_v2 = vld [vmem:[#allocation6 + $0x358] sm:$0xff]  }
  0xe3   : > { %3377 = vmatpush3.bf16.msra.mxu0 %v3840_v3  ;;  %v3864_v3 = vld [vmem:[#allocation6 + $0x318] sm:$0xff]  }
  0xe4   : > { %3441 = vmatpush3.bf16.msra.mxu1 %v3842_v5  ;;  %3378 = vmatprep.subr.bf16.mxu0 %v3843_v6  ;;  %v3869_v5 = vld [vmem:[#allocation6 + $0x3e0] sm:$0xff]  }
  0xe5   : > { %3442 = vmatprep.subr.bf16.mxu1 %v3845_v59  ;;  %1348 = vmatmul.mubr.bf16.gmra.mrb[44].mxu0 %v4363_v12  ;;  %v3868_v6 = vld [vmem:[#allocation6 + $0x320] sm:$0xff]  }
  0xe6   : > { %1445 = vmatmul.mubr.bf16.gmra.mrb[44].mxu1 %v4388_v26  ;;  %2937 = vmatprep.mubr.msk.bf16.mxu0 %vm4527_vm6, %v4580_v38  ;;  %v3870_v59 = vld [vmem:[#allocation6 + $0x3a0] sm:$0xff]  }
  0xe7   : > { %2969 = vmatprep.mubr.msk.bf16.mxu1 %vm4527_vm6, %v4596_v60  ;;  %3379 = vmatpush3.bf16.msra.mxu0 %v3844_v11  ;;  %v3872_v11 = vld [vmem:[#allocation6 + $0x328] sm:$0xff]  }
  0xe8   : > { %3443 = vmatpush3.bf16.msra.mxu1 %v3846_v17  ;;  %3380 = vmatprep.subr.bf16.mxu0 %v3847_v19  ;;  %v3875_v17 = vld [vmem:[#allocation6 + $0x370] sm:$0xff]  }
  0xe9   : > { %3444 = vmatprep.subr.bf16.mxu1 %v3849_v20  ;;  %v3877_v19 = vld [vmem:[#allocation6 + $0x3f0] sm:$0xff]  }
  0xea   : > { %v3876_v20 = vld [vmem:[#allocation6 + $0x330] sm:$0xff]  }
  0xeb   : > { %3381 = vmatpush3.bf16.msra.mxu0 %v3848_v8  ;;  %v3879_v8 = vld [vmem:[#allocation6 + $0x378] sm:$0xff]  }
  0xec   : > { %3445 = vmatpush3.bf16.msra.mxu1 %v3850_v10  ;;  %3494 = vmatprep.subr.bf16.mxu0 %v3851_v23  ;;  %v3882_v10 = vld [vmem:[#allocation6 + $0x3b8] sm:$0xff]   ;;  %v258_v23 = vld [vmem:[%s256_s12 + $0x8] sm:$0xff] }
  0xed   : > { %3558 = vmatprep.subr.bf16.mxu1 %v3853_v46  ;;  %1356 = vmatmul.mubr.bf16.gmra.mrb[48].mxu0 %v4388_v26  ;;  %v262_v46 = vstv %s261_s20 }
  0xee   : > { %1453 = vmatmul.mubr.bf16.gmra.mrb[48].mxu1 %v4415_v47  ;;  %2941 = vmatprep.mubr.msk.bf16.mxu0 %vm4527_vm6, %v4596_v60  ;;  %v4711_v29 = vmul.f32 %v262_v46, %v258_v23 }
  0xef   : > { %2973 = vmatprep.mubr.msk.bf16.mxu1 %vm4527_vm6, %v4612_v28 }
  0xf0   : > { %v336_v14 = vrot.slane %v4711_v29, 7 }
  0xf5   : > { %1364 = vmatmul.mubr.bf16.gmra.mrb[52].mxu0 %v4415_v47 }
  0xf6   : > { %1461 = vmatmul.mubr.bf16.gmra.mrb[52].mxu1 %v4440_v4  ;;  %2945 = vmatprep.mubr.msk.bf16.mxu0 %vm4527_vm6, %v4612_v28 }
  0xf7   : > { %2977 = vmatprep.mubr.msk.bf16.mxu1 %vm4527_vm6, %v4628_v37 }
  0xfd   : > { %1372 = vmatmul.mubr.bf16.gmra.mrb[56].mxu0 %v4440_v4 }
  0xfe   : > { %1469 = vmatmul.mubr.bf16.gmra.mrb[56].mxu1 %v4466_v25  ;;  %2949 = vmatprep.mubr.msk.bf16.mxu0 %vm4527_vm6, %v4628_v37 }
  0xff   : > { %2981 = vmatprep.mubr.msk.bf16.mxu1 %vm4527_vm6, %v4644_v18 }
 0x105   : > { %1380 = vmatmul.mubr.bf16.gmra.mrb[60].mxu0 %v4466_v25 }
 0x106   : > { %1477 = vmatmul.mubr.bf16.gmra.mrb[60].mxu1 %v4493_v35  ;;  %1824 = vmatprep.mubr.bf16.mxu0 %v4303_v43 }
 0x107   : > { %1921 = vmatprep.mubr.bf16.mxu1 %v4340_v61 }
 0x10d   : > { %2985 = vmatmul.mubr.msk.bf16.vlgmr.msra.gmra.mrb[64].mxu0 %vm4313_vm3, %v4327_v56  ;;  %v3865_v56 = vld [vmem:[#allocation6 + $0x3d8] sm:$0xff]  }
 0x10e   : > { %3017 = vmatmul.mubr.msk.bf16.vlgmr.msra.gmra.mrb[64].mxu1 %vm4313_vm3, %v4355_v9  ;;  %3495 = vmatpush3.bf16.msra.mxu0 %v3852_v21 }
 0x10f   : > { %3559 = vmatpush3.bf16.msra.mxu1 %v3854_v33  ;;  %1832 = vmatprep.mubr.bf16.mxu0 %v4340_v61 }
 0x110   : > { %1929 = vmatprep.mubr.bf16.mxu1 %v4363_v12  ;;  %3496 = vmatprep.subr.bf16.mxu0 %v3855_v50 }
 0x111   : > { %3560 = vmatprep.subr.bf16.mxu1 %v3857_v51 }
 0x112   : > { %3497 = vmatpush3.bf16.msra.mxu0 %v3856_v39 }
 0x113   : > { %3561 = vmatpush3.bf16.msra.mxu1 %v3858_v52  ;;  %3498 = vmatprep.subr.bf16.mxu0 %v3859_v41 }
 0x114   : > { %3562 = vmatprep.subr.bf16.mxu1 %v3861_v40 }
 0x115   : > { %2989 = vmatmul.mubr.msk.bf16.gmra.mrb[68].mxu0 %vm4313_vm3, %v4355_v9  ;;  %v3873_v9 = vld [vmem:[#allocation6 + $0x3e8] sm:$0xff]  }
 0x116   : > { %3021 = vmatmul.mubr.msk.bf16.gmra.mrb[68].mxu1 %vm4313_vm3, %v4384_v24  ;;  %1840 = vmatprep.mubr.bf16.mxu0 %v4363_v12 }
 0x117   : > { %1937 = vmatprep.mubr.bf16.mxu1 %v4388_v26  ;;  %3499 = vmatpush3.bf16.msra.mxu0 %v3860_v55 }
 0x118   : > { %3563 = vmatpush3.bf16.msra.mxu1 %v3862_v63  ;;  %3500 = vmatprep.subr.bf16.mxu0 %v3863_v2 }
 0x119   : > { %3564 = vmatprep.subr.bf16.mxu1 %v3865_v56 }
 0x11b   : > { %3501 = vmatpush3.bf16.msra.mxu0 %v3864_v3 }
 0x11c   : > { %3565 = vmatpush3.bf16.msra.mxu1 %v3866_v30  ;;  %3502 = vmatprep.subr.bf16.mxu0 %v3867_v36 }
 0x11d   : > { %3566 = vmatprep.subr.bf16.mxu1 %v3869_v5  ;;  %2993 = vmatmul.mubr.msk.bf16.gmra.mrb[72].mxu0 %vm4313_vm3, %v4384_v24  ;;  %v3878_v24 = vld [vmem:[#allocation6 + $0x3b0] sm:$0xff]  }
 0x11e   : > { %3025 = vmatmul.mubr.msk.bf16.gmra.mrb[72].mxu1 %vm4313_vm3, %v4410_v42  ;;  %1848 = vmatprep.mubr.bf16.mxu0 %v4388_v26 }
 0x11f   : > { %1945 = vmatprep.mubr.bf16.mxu1 %v4415_v47  ;;  %3503 = vmatpush3.bf16.msra.mxu0 %v3868_v6 }
 0x120   : > { %3567 = vmatpush3.bf16.msra.mxu1 %v3870_v59  ;;  %3504 = vmatprep.subr.bf16.mxu0 %v3871_v7 }
 0x121   : > { %3568 = vmatprep.subr.bf16.mxu1 %v3873_v9 }
 0x123   : > { %3505 = vmatpush3.bf16.msra.mxu0 %v3872_v11 }
 0x124   : > { %3569 = vmatpush3.bf16.msra.mxu1 %v3874_v16  ;;  %3506 = vmatprep.subr.bf16.mxu0 %v3875_v17 }
 0x125   : > { %3570 = vmatprep.subr.bf16.mxu1 %v3877_v19  ;;  %2997 = vmatmul.mubr.msk.bf16.gmra.mrb[76].mxu0 %vm4313_vm3, %v4410_v42  ;;  %v257_v42 = vld [vmem:[%s256_s12] sm:$0xff] }
 0x126   : > { %3029 = vmatmul.mubr.msk.bf16.gmra.mrb[76].mxu1 %vm4313_vm3, %v4436_v0  ;;  %1856 = vmatprep.mubr.bf16.mxu0 %v4415_v47 }
 0x127   : > { %1953 = vmatprep.mubr.bf16.mxu1 %v4440_v4  ;;  %3507 = vmatpush3.bf16.msra.mxu0 %v3876_v20 }
 0x128   : > { %3571 = vmatpush3.bf16.msra.mxu1 %v3878_v24  ;;  %3508 = vmatprep.subr.bf16.mxu0 %v3879_v8 }
 0x129   : > { %3572 = vmatprep.subr.bf16.mxu1 %v3881_v53 }
 0x12b   : > { %3509 = vmatpush3.bf16.msra.mxu0 %v3880_v54  ;;  %v427_v54 = vrot.slane %v4711_v29, 1 }
 0x12c   : > { %3573 = vmatpush3.bf16.msra.mxu1 %v3882_v10 }
 0x12d   : > { %3001 = vmatmul.mubr.msk.bf16.gmra.mrb[80].mxu0 %vm4313_vm3, %v4436_v0  ;;  %v4709_v0 = vmul.f32 %v262_v46, %v257_v42 }
 0x12e   : > { %3033 = vmatmul.mubr.msk.bf16.gmra.mrb[80].mxu1 %vm4313_vm3, %v4462_v22  ;;  %1864 = vmatprep.mubr.bf16.mxu0 %v4440_v4 }
 0x12f   : > { %1961 = vmatprep.mubr.bf16.mxu1 %v4466_v25  ;;  %v4716_v31 = vpack.c.bf16 %v4711_v29, %v4709_v0  ;;  %v326_v13 = vrot.slane %v4709_v0, 7  ;;  %v417_v53 = vrot.slane %v4709_v0, 1 }
 0x131   : > { %v357_v44 = vsel %vm337_vm1, %v336_v14, %v326_v13  ;;  %v438_v0 = vsel %vm428_vm4, %v417_v53, %v427_v54  ;;  %v448_v29 = vsel %vm428_vm4, %v427_v54, %v417_v53 }
 0x135   : > { %3005 = vmatmul.mubr.msk.bf16.gmra.mrb[84].mxu0 %vm4313_vm3, %v4462_v22  ;;  %v347_v22 = vsel %vm337_vm1, %v326_v13, %v336_v14 }
 0x136   : > { %3037 = vmatmul.mubr.msk.bf16.gmra.mrb[84].mxu1 %vm4313_vm3, %v4488_v34  ;;  %1872 = vmatprep.mubr.bf16.mxu0 %v4466_v25  ;;  %v3044_v45 = vpack.c.bf16 %v347_v22, %v357_v44 }
 0x137   : > { %1969 = vmatprep.mubr.bf16.mxu1 %v4493_v35 }
 0x13d   : > { %3009 = vmatmul.mubr.msk.bf16.gmra.mrb[88].mxu0 %vm4313_vm3, %v4488_v34  ;;  %v4771_v34 = vld [vmem:[%s5010_s2] ss:$0 sm:$0xff] }
 0x13e   : > { %3041 = vmatmul.mubr.msk.bf16.gmra.mrb[88].mxu1 %vm4313_vm3, %v4522_v57  ;;  %1880 = vmatprep.mubr.bf16.mxu0 %v4493_v35 }
 0x13f   : > { %1977 = vmatprep.mubr.bf16.mxu1 %v4716_v31 }
 0x145   : > { %3013 = vmatmul.mubr.msk.bf16.gmra.mrb[92].mxu0 %vm4313_vm3, %v4522_v57 }
 0x146   : > { %3045 = vmatmul.mubr.msk.bf16.gmra.mrb[92].mxu1 %vm4313_vm3, %v3044_v45  ;;  %3049 = vmatprep.mubr.msk.bf16.mxu0 %vm4527_vm6, %v4524_v58 }
 0x147   : > { %3081 = vmatprep.mubr.msk.bf16.mxu1 %vm4527_vm6, %v4550_v15 }
 0x14d   : > { %2326 = vmatmul.mubr.bf16.vlgmr.msra.gmra.mrb[96].mxu0 %v4303_v43 }
 0x14e   : > { %2423 = vmatmul.mubr.bf16.vlgmr.msra.gmra.mrb[96].mxu1 %v4340_v61  ;;  %3053 = vmatprep.mubr.msk.bf16.mxu0 %vm4527_vm6, %v4550_v15 }
 0x14f   : > { %3085 = vmatprep.mubr.msk.bf16.mxu1 %vm4527_vm6, %v4564_v27 }
 0x155   : > { %2334 = vmatmul.mubr.bf16.gmra.mrb[100].mxu0 %v4340_v61 }
 0x156   : > { %2431 = vmatmul.mubr.bf16.gmra.mrb[100].mxu1 %v4363_v12  ;;  %3057 = vmatprep.mubr.msk.bf16.mxu0 %vm4527_vm6, %v4564_v27 }
 0x157   : > { %3089 = vmatprep.mubr.msk.bf16.mxu1 %vm4527_vm6, %v4580_v38 }
 0x15d   : > { %2342 = vmatmul.mubr.bf16.gmra.mrb[104].mxu0 %v4363_v12 }
 0x15e   : > { %2439 = vmatmul.mubr.bf16.gmra.mrb[104].mxu1 %v4388_v26  ;;  %3061 = vmatprep.mubr.msk.bf16.mxu0 %vm4527_vm6, %v4580_v38 }
 0x15f   : > { %3093 = vmatprep.mubr.msk.bf16.mxu1 %vm4527_vm6, %v4596_v60 }
 0x160   : > { %v3126_v49 = vpop.f32.mrb[0].mxu0 }
 0x161   : > { %v3190_v43 = vpop.f32.mrb[0].mxu1  ;;  %v3127_v57 = vpop.f32.mrb[1].mxu0 }
 0x162   : > { %v3191_v61 = vpop.f32.mrb[1].mxu1  ;;  %v3128_v15 = vadd.f32 %v3127_v57, %v3126_v49  ;;  %v3129_v27 = vpop.f32.mrb[2].mxu0 }
 0x163   : > { %v3192_v58 = vadd.f32 %v3191_v61, %v3190_v43  ;;  %v3193_v12 = vpop.f32.mrb[2].mxu1  ;;  %v3130_v32 = vpop.f32.mrb[3].mxu0  ;;  %v3108_v61 = vpack.c.bf16 %v448_v29, %v438_v0 }
 0x164   : > { %v3194_v48 = vpop.f32.mrb[3].mxu1  ;;  %v827_v38 = vadd.f32 %v3128_v15, %v4771_v34  ;;  %v3131_v21 = vadd.f32 %v3130_v32, %v3129_v27 }
 0x165   : > { %v3195_v33 = vadd.f32 %v3194_v48, %v3193_v12  ;;  %2350 = vmatmul.mubr.bf16.gmra.mrb[108].mxu0 %v4388_v26 }
 0x166   : > { %2447 = vmatmul.mubr.bf16.gmra.mrb[108].mxu1 %v4415_v47  ;;  %v924_v50 = vadd.f32 %v3192_v58, %v827_v38  ;;  %v830_v51 = vadd.f32 %v3131_v21, %v4771_v34  ;;  %3065 = vmatprep.mubr.msk.bf16.mxu0 %vm4527_vm6, %v4596_v60 }
 0x167   : > { %3097 = vmatprep.mubr.msk.bf16.mxu1 %vm4527_vm6, %v4612_v28 }
 0x168   : > { %986 = vst [vmem:[%s4785_s29] sm:$0xff] %v924_v50  ;;  %v927_v39 = vadd.f32 %v3195_v33, %v830_v51  ;;  %v3132_v40 = vpop.f32.mrb[4].mxu0 }
 0x169   : > { %v3196_v52 = vpop.f32.mrb[4].mxu1  ;;  %v3133_v41 = vpop.f32.mrb[5].mxu0 }
 0x16a   : > { %v3197_v26 = vpop.f32.mrb[5].mxu1  ;;  %987 = vst [vmem:[%s4785_s29 + $0x8] sm:$0xff] %v927_v39  ;;  %v3134_v2 = vadd.f32 %v3133_v41, %v3132_v40  ;;  %v3135_v56 = vpop.f32.mrb[6].mxu0 }
 0x16b   : > { %v3198_v55 = vadd.f32 %v3197_v26, %v3196_v52  ;;  %v3199_v63 = vpop.f32.mrb[6].mxu1  ;;  %v3136_v30 = vpop.f32.mrb[7].mxu0 }
 0x16c   : > { %v3200_v3 = vpop.f32.mrb[7].mxu1  ;;  %v835_v60 = vadd.f32 %v3134_v2, %v4771_v34  ;;  %v3137_v5 = vadd.f32 %v3136_v30, %v3135_v56 }
 0x16d   : > { %v3201_v36 = vadd.f32 %v3200_v3, %v3199_v63  ;;  %2358 = vmatmul.mubr.bf16.gmra.mrb[112].mxu0 %v4415_v47 }
 0x16e   : > { %2455 = vmatmul.mubr.bf16.gmra.mrb[112].mxu1 %v4440_v4  ;;  %v932_v6 = vadd.f32 %v3198_v55, %v835_v60  ;;  %v838_v59 = vadd.f32 %v3137_v5, %v4771_v34  ;;  %3069 = vmatprep.mubr.msk.bf16.mxu0 %vm4527_vm6, %v4612_v28 }
 0x16f   : > { %3101 = vmatprep.mubr.msk.bf16.mxu1 %vm4527_vm6, %v4628_v37 }
 0x170   : > { %988 = vst [vmem:[%s4785_s29 + $0x10] sm:$0xff] %v932_v6  ;;  %v935_v9 = vadd.f32 %v3201_v36, %v838_v59  ;;  %v3138_v11 = vpop.f32.mrb[8].mxu0 }
 0x171   : > { %v3202_v7 = vpop.f32.mrb[8].mxu1  ;;  %v3139_v17 = vpop.f32.mrb[9].mxu0 }
 0x172   : > { %v3203_v16 = vpop.f32.mrb[9].mxu1  ;;  %989 = vst [vmem:[%s4785_s29 + $0x18] sm:$0xff] %v935_v9  ;;  %v3140_v47 = vadd.f32 %v3139_v17, %v3138_v11  ;;  %v3141_v24 = vpop.f32.mrb[10].mxu0 }
 0x173   : > { %v3204_v19 = vadd.f32 %v3203_v16, %v3202_v7  ;;  %v3205_v20 = vpop.f32.mrb[10].mxu1  ;;  %v3142_v10 = vpop.f32.mrb[11].mxu0 }
 0x174   : > { %v3206_v8 = vpop.f32.mrb[11].mxu1  ;;  %v843_v28 = vadd.f32 %v3140_v47, %v4771_v34  ;;  %v3143_v23 = vadd.f32 %v3142_v10, %v3141_v24 }
 0x175   : > { %v3207_v42 = vadd.f32 %v3206_v8, %v3205_v20  ;;  %2366 = vmatmul.mubr.bf16.gmra.mrb[116].mxu0 %v4440_v4 }
 0x176   : > { %2463 = vmatmul.mubr.bf16.gmra.mrb[116].mxu1 %v4466_v25  ;;  %v940_v46 = vadd.f32 %v3204_v19, %v843_v28  ;;  %v846_v13 = vadd.f32 %v3143_v23, %v4771_v34  ;;  %3073 = vmatprep.mubr.msk.bf16.mxu0 %vm4527_vm6, %v4628_v37 }
 0x177   : > { %3105 = vmatprep.mubr.msk.bf16.mxu1 %vm4527_vm6, %v4644_v18 }
 0x178   : > { %990 = vst [vmem:[%s4785_s29 + $0x20] sm:$0xff] %v940_v46  ;;  %v943_v4 = vadd.f32 %v3207_v42, %v846_v13  ;;  %v3144_v22 = vpop.f32.mrb[12].mxu0 }
 0x179   : > { %v3208_v14 = vpop.f32.mrb[12].mxu1  ;;  %v3145_v45 = vpop.f32.mrb[13].mxu0 }
 0x17a   : > { %v3209_v44 = vpop.f32.mrb[13].mxu1  ;;  %991 = vst [vmem:[%s4785_s29 + $0x28] sm:$0xff] %v943_v4  ;;  %v3146_v57 = vadd.f32 %v3145_v45, %v3144_v22  ;;  %v3147_v58 = vpop.f32.mrb[14].mxu0 }
 0x17b   : > { %v3210_v43 = vadd.f32 %v3209_v44, %v3208_v14  ;;  %v3211_v49 = vpop.f32.mrb[14].mxu1  ;;  %v3148_v12 = vpop.f32.mrb[15].mxu0 }
 0x17c   : > { %v3212_v37 = vpop.f32.mrb[15].mxu1  ;;  %v851_v27 = vadd.f32 %v3146_v57, %v4771_v34  ;;  %v3149_v1 = vadd.f32 %v3148_v12, %v3147_v58 }
 0x17d   : > { %v3213_v15 = vadd.f32 %v3212_v37, %v3211_v49  ;;  %2374 = vmatmul.mubr.bf16.gmra.mrb[120].mxu0 %v4466_v25 }
 0x17e   : > { %2471 = vmatmul.mubr.bf16.gmra.mrb[120].mxu1 %v4493_v35  ;;  %v948_v48 = vadd.f32 %v3210_v43, %v851_v27  ;;  %v854_v32 = vadd.f32 %v3149_v1, %v4771_v34  ;;  %3077 = vmatprep.mubr.msk.bf16.mxu0 %vm4527_vm6, %v4644_v18 }
 0x17f   : > { %3109 = vmatprep.mubr.msk.bf16.mxu1 %vm4527_vm6, %v3108_v61 }
 0x180   : > { %992 = vst [vmem:[%s4785_s29 + $0x30] sm:$0xff] %v948_v48  ;;  %v951_v38 = vadd.f32 %v3213_v15, %v854_v32  ;;  %v3150_v21 = vpop.f32.mrb[16].mxu0 }
 0x181   : > { %v3214_v33 = vpop.f32.mrb[16].mxu1  ;;  %v3151_v51 = vpop.f32.mrb[17].mxu0 }
 0x182   : > { %v3215_v50 = vpop.f32.mrb[17].mxu1  ;;  %993 = vst [vmem:[%s4785_s29 + $0x38] sm:$0xff] %v951_v38  ;;  %v3152_v25 = vadd.f32 %v3151_v51, %v3150_v21  ;;  %v3153_v40 = vpop.f32.mrb[18].mxu0 }
 0x183   : > { %v3216_v52 = vadd.f32 %v3215_v50, %v3214_v33  ;;  %v3217_v39 = vpop.f32.mrb[18].mxu1  ;;  %v3154_v41 = vpop.f32.mrb[19].mxu0 }
 0x184   : > { %v3218_v26 = vpop.f32.mrb[19].mxu1  ;;  %v859_v63 = vadd.f32 %v3152_v25, %v4771_v34  ;;  %v3155_v62 = vadd.f32 %v3154_v41, %v3153_v40 }
 0x185   : > { %v3219_v55 = vadd.f32 %v3218_v26, %v3217_v39  ;;  %2382 = vmatmul.mubr.bf16.gmra.mrb[124].mxu0 %v4493_v35 }
 0x186   : > { %2479 = vmatmul.mubr.bf16.gmra.mrb[124].mxu1 %v4716_v31  ;;  %v956_v18 = vadd.f32 %v3216_v52, %v859_v63  ;;  %v862_v2 = vadd.f32 %v3155_v62, %v4771_v34 }
 0x188   : > { %994 = vst [vmem:[%s4785_s29 + $0x40] sm:$0xff] %v956_v18  ;;  %v959_v3 = vadd.f32 %v3219_v55, %v862_v2  ;;  %v3156_v30 = vpop.f32.mrb[20].mxu0 }
 0x189   : > { %v3220_v56 = vpop.f32.mrb[20].mxu1  ;;  %v3157_v60 = vpop.f32.mrb[21].mxu0 }
 0x18a   : > { %v3221_v36 = vpop.f32.mrb[21].mxu1  ;;  %995 = vst [vmem:[%s4785_s29 + $0x48] sm:$0xff] %v959_v3  ;;  %v3158_v59 = vadd.f32 %v3157_v60, %v3156_v30  ;;  %v3159_v7 = vpop.f32.mrb[22].mxu0 }
 0x18b   : > { %v3222_v5 = vadd.f32 %v3221_v36, %v3220_v56  ;;  %v3223_v6 = vpop.f32.mrb[22].mxu1  ;;  %v3160_v31 = vpop.f32.mrb[23].mxu0 }
 0x18c   : > { %v3224_v9 = vpop.f32.mrb[23].mxu1  ;;  %v867_v35 = vadd.f32 %v3158_v59, %v4771_v34  ;;  %v3161_v16 = vadd.f32 %v3160_v31, %v3159_v7 }
 0x18d   : > { %v3225_v11 = vadd.f32 %v3224_v9, %v3223_v6 }
 0x18e   : > { %v964_v17 = vadd.f32 %v3222_v5, %v867_v35  ;;  %v870_v19 = vadd.f32 %v3161_v16, %v4771_v34 }
 0x190   : > { %996 = vst [vmem:[%s4785_s29 + $0x50] sm:$0xff] %v964_v17  ;;  %v967_v47 = vadd.f32 %v3225_v11, %v870_v19  ;;  %v3162_v24 = vpop.f32.mrb[24].mxu0 }
 0x191   : > { %v3226_v20 = vpop.f32.mrb[24].mxu1  ;;  %v3163_v53 = vpop.f32.mrb[25].mxu0 }
 0x192   : > { %v3227_v8 = vpop.f32.mrb[25].mxu1  ;;  %997 = vst [vmem:[%s4785_s29 + $0x58] sm:$0xff] %v967_v47  ;;  %v3164_v42 = vadd.f32 %v3163_v53, %v3162_v24  ;;  %v3165_v28 = vpop.f32.mrb[26].mxu0 }
 0x193   : > { %v3228_v54 = vadd.f32 %v3227_v8, %v3226_v20  ;;  %v3229_v10 = vpop.f32.mrb[26].mxu1  ;;  %v3166_v46 = vpop.f32.mrb[27].mxu0 }
 0x194   : > { %v3230_v23 = vpop.f32.mrb[27].mxu1  ;;  %v875_v0 = vadd.f32 %v3164_v42, %v4771_v34  ;;  %v3167_v29 = vadd.f32 %v3166_v46, %v3165_v28 }
 0x195   : > { %v3231_v13 = vadd.f32 %v3230_v23, %v3229_v10 }
 0x196   : > { %v972_v14 = vadd.f32 %v3228_v54, %v875_v0  ;;  %v878_v4 = vadd.f32 %v3167_v29, %v4771_v34 }
 0x198   : > { %998 = vst [vmem:[%s4785_s29 + $0x60] sm:$0xff] %v972_v14  ;;  %v975_v44 = vadd.f32 %v3231_v13, %v878_v4  ;;  %v3168_v45 = vpop.f32.mrb[28].mxu0 }
 0x199   : > { %v3232_v22 = vpop.f32.mrb[28].mxu1  ;;  %v3169_v49 = vpop.f32.mrb[29].mxu0 }
 0x19a   : > { %v3233_v43 = vpop.f32.mrb[29].mxu1  ;;  %999 = vst [vmem:[%s4785_s29 + $0x68] sm:$0xff] %v975_v44  ;;  %v3170_v58 = vadd.f32 %v3169_v49, %v3168_v45  ;;  %v3171_v37 = vpop.f32.mrb[30].mxu0 }
 0x19b   : > { %v3234_v61 = vadd.f32 %v3233_v43, %v3232_v22  ;;  %v3235_v57 = vpop.f32.mrb[30].mxu1  ;;  %v3172_v15 = vpop.f32.mrb[31].mxu0 }
 0x19c   : > { %v3236_v12 = vpop.f32.mrb[31].mxu1  ;;  %v883_v1 = vadd.f32 %v3170_v58, %v4771_v34  ;;  %v3173_v48 = vadd.f32 %v3172_v15, %v3171_v37 }
 0x19d   : > { %v3237_v27 = vadd.f32 %v3236_v12, %v3235_v57 }
 0x19e   : > { %v980_v32 = vadd.f32 %v3234_v61, %v883_v1  ;;  %v886_v33 = vadd.f32 %v3173_v48, %v4771_v34 }
 0x1a0   : > { %1000 = vst [vmem:[%s4785_s29 + $0x70] sm:$0xff] %v980_v32  ;;  %v983_v21 = vadd.f32 %v3237_v27, %v886_v33  ;;  %v3254_v50 = vpop.f32.mrb[32].mxu0 }
 0x1a1   : > { %v3318_v38 = vpop.f32.mrb[32].mxu1  ;;  %v3255_v52 = vpop.f32.mrb[33].mxu0 }
 0x1a2   : > { %v3319_v51 = vpop.f32.mrb[33].mxu1  ;;  %1001 = vst [vmem:[%s4785_s29 + $0x78] sm:$0xff] %v983_v21  ;;  %v3256_v40 = vadd.f32 %v3255_v52, %v3254_v50  ;;  %v3257_v26 = vpop.f32.mrb[34].mxu0 }
 0x1a3   : > { %v3320_v39 = vadd.f32 %v3319_v51, %v3318_v38  ;;  %v3321_v25 = vpop.f32.mrb[34].mxu1  ;;  %v3258_v55 = vpop.f32.mrb[35].mxu0 }
 0x1a4   : > { %v3322_v41 = vpop.f32.mrb[35].mxu1  ;;  %v1326_v62 = vadd.f32 %v3256_v40, %v4771_v34  ;;  %v3259_v18 = vadd.f32 %v3258_v55, %v3257_v26 }
 0x1a5   : > { %v3323_v63 = vadd.f32 %v3322_v41, %v3321_v25 }
 0x1a6   : > { %v1423_v2 = vadd.f32 %v3320_v39, %v1326_v62  ;;  %v1329_v56 = vadd.f32 %v3259_v18, %v4771_v34 }
 0x1a8   : > { %2734 = vst [vmem:[%s4785_s29 + $0x80] sm:$0xff] %v1423_v2  ;;  %v1426_v30 = vadd.f32 %v3323_v63, %v1329_v56  ;;  %v3260_v36 = vpop.f32.mrb[36].mxu0 }
 0x1a9   : > { %v3324_v3 = vpop.f32.mrb[36].mxu1  ;;  %v3261_v5 = vpop.f32.mrb[37].mxu0 }
 0x1aa   : > { %v3325_v60 = vpop.f32.mrb[37].mxu1  ;;  %2735 = vst [vmem:[%s4785_s29 + $0x88] sm:$0xff] %v1426_v30  ;;  %v3262_v7 = vadd.f32 %v3261_v5, %v3260_v36  ;;  %v3263_v9 = vpop.f32.mrb[38].mxu0 }
 0x1ab   : > { %v3326_v6 = vadd.f32 %v3325_v60, %v3324_v3  ;;  %v3327_v59 = vpop.f32.mrb[38].mxu1  ;;  %v3264_v11 = vpop.f32.mrb[39].mxu0 }
 0x1ac   : > { %v3328_v31 = vpop.f32.mrb[39].mxu1  ;;  %v1334_v16 = vadd.f32 %v3262_v7, %v4771_v34  ;;  %v3265_v17 = vadd.f32 %v3264_v11, %v3263_v9 }
 0x1ad   : > { %v3329_v35 = vadd.f32 %v3328_v31, %v3327_v59 }
 0x1ae   : > { %v1431_v19 = vadd.f32 %v3326_v6, %v1334_v16  ;;  %v1337_v20 = vadd.f32 %v3265_v17, %v4771_v34 }
 0x1b0   : > { %2736 = vst [vmem:[%s4785_s29 + $0x90] sm:$0xff] %v1431_v19  ;;  %v1434_v24 = vadd.f32 %v3329_v35, %v1337_v20  ;;  %v3266_v8 = vpop.f32.mrb[40].mxu0 }
 0x1b1   : > { %v3330_v47 = vpop.f32.mrb[40].mxu1  ;;  %v3267_v54 = vpop.f32.mrb[41].mxu0 }
 0x1b2   : > { %v3331_v53 = vpop.f32.mrb[41].mxu1  ;;  %2737 = vst [vmem:[%s4785_s29 + $0x98] sm:$0xff] %v1434_v24  ;;  %v3268_v28 = vadd.f32 %v3267_v54, %v3266_v8  ;;  %v3269_v23 = vpop.f32.mrb[42].mxu0 }
 0x1b3   : > { %v3332_v10 = vadd.f32 %v3331_v53, %v3330_v47  ;;  %v3333_v42 = vpop.f32.mrb[42].mxu1  ;;  %v3270_v13 = vpop.f32.mrb[43].mxu0 }
 0x1b4   : > { %v3334_v46 = vpop.f32.mrb[43].mxu1  ;;  %v1342_v29 = vadd.f32 %v3268_v28, %v4771_v34  ;;  %v3271_v14 = vadd.f32 %v3270_v13, %v3269_v23 }
 0x1b5   : > { %v3335_v0 = vadd.f32 %v3334_v46, %v3333_v42 }
 0x1b6   : > { %v1439_v4 = vadd.f32 %v3332_v10, %v1342_v29  ;;  %v1345_v22 = vadd.f32 %v3271_v14, %v4771_v34 }
 0x1b8   : > { %2738 = vst [vmem:[%s4785_s29 + $0xa0] sm:$0xff] %v1439_v4  ;;  %v1442_v45 = vadd.f32 %v3335_v0, %v1345_v22  ;;  %v3272_v43 = vpop.f32.mrb[44].mxu0 }
 0x1b9   : > { %v3336_v44 = vpop.f32.mrb[44].mxu1  ;;  %v3273_v61 = vpop.f32.mrb[45].mxu0 }
 0x1ba   : > { %v3337_v49 = vpop.f32.mrb[45].mxu1  ;;  %2739 = vst [vmem:[%s4785_s29 + $0xa8] sm:$0xff] %v1442_v45  ;;  %v3274_v37 = vadd.f32 %v3273_v61, %v3272_v43  ;;  %v3275_v12 = vpop.f32.mrb[46].mxu0 }
 0x1bb   : > { %v3338_v57 = vadd.f32 %v3337_v49, %v3336_v44  ;;  %v3339_v58 = vpop.f32.mrb[46].mxu1  ;;  %v3276_v27 = vpop.f32.mrb[47].mxu0 }
 0x1bc   : > { %v3340_v15 = vpop.f32.mrb[47].mxu1  ;;  %v1350_v48 = vadd.f32 %v3274_v37, %v4771_v34  ;;  %v3277_v32 = vadd.f32 %v3276_v27, %v3275_v12 }
 0x1bd   : > { %v3341_v1 = vadd.f32 %v3340_v15, %v3339_v58 }
 0x1be   : > { %v1447_v33 = vadd.f32 %v3338_v57, %v1350_v48  ;;  %v1353_v38 = vadd.f32 %v3277_v32, %v4771_v34 }
 0x1c0   : > { %2740 = vst [vmem:[%s4785_s29 + $0xb0] sm:$0xff] %v1447_v33  ;;  %v1450_v50 = vadd.f32 %v3341_v1, %v1353_v38  ;;  %v3278_v51 = vpop.f32.mrb[48].mxu0 }
 0x1c1   : > { %v3342_v21 = vpop.f32.mrb[48].mxu1  ;;  %v3279_v39 = vpop.f32.mrb[49].mxu0 }
 0x1c2   : > { %v3343_v52 = vpop.f32.mrb[49].mxu1  ;;  %2741 = vst [vmem:[%s4785_s29 + $0xb8] sm:$0xff] %v1450_v50  ;;  %v3280_v26 = vadd.f32 %v3279_v39, %v3278_v51  ;;  %v3281_v41 = vpop.f32.mrb[50].mxu0 }
 0x1c3   : > { %v3344_v25 = vadd.f32 %v3343_v52, %v3342_v21  ;;  %v3345_v40 = vpop.f32.mrb[50].mxu1  ;;  %v3282_v63 = vpop.f32.mrb[51].mxu0 }
 0x1c4   : > { %v3346_v55 = vpop.f32.mrb[51].mxu1  ;;  %v1358_v18 = vadd.f32 %v3280_v26, %v4771_v34  ;;  %v3283_v2 = vadd.f32 %v3282_v63, %v3281_v41 }
 0x1c5   : > { %v3347_v62 = vadd.f32 %v3346_v55, %v3345_v40 }
 0x1c6   : > { %v1455_v56 = vadd.f32 %v3344_v25, %v1358_v18  ;;  %v1361_v3 = vadd.f32 %v3283_v2, %v4771_v34 }
 0x1c8   : > { %2742 = vst [vmem:[%s4785_s29 + $0xc0] sm:$0xff] %v1455_v56  ;;  %v1458_v36 = vadd.f32 %v3347_v62, %v1361_v3  ;;  %v3284_v60 = vpop.f32.mrb[52].mxu0 }
 0x1c9   : > { %v3348_v30 = vpop.f32.mrb[52].mxu1  ;;  %v3285_v6 = vpop.f32.mrb[53].mxu0 }
 0x1ca   : > { %v3349_v5 = vpop.f32.mrb[53].mxu1  ;;  %2743 = vst [vmem:[%s4785_s29 + $0xc8] sm:$0xff] %v1458_v36  ;;  %v3286_v9 = vadd.f32 %v3285_v6, %v3284_v60  ;;  %v3287_v31 = vpop.f32.mrb[54].mxu0 }
 0x1cb   : > { %v3350_v59 = vadd.f32 %v3349_v5, %v3348_v30  ;;  %v3351_v7 = vpop.f32.mrb[54].mxu1  ;;  %v3288_v35 = vpop.f32.mrb[55].mxu0 }
 0x1cc   : > { %v3352_v11 = vpop.f32.mrb[55].mxu1  ;;  %v1366_v17 = vadd.f32 %v3286_v9, %v4771_v34  ;;  %v3289_v19 = vadd.f32 %v3288_v35, %v3287_v31 }
 0x1cd   : > { %v3353_v16 = vadd.f32 %v3352_v11, %v3351_v7 }
 0x1ce   : > { %v1463_v20 = vadd.f32 %v3350_v59, %v1366_v17  ;;  %v1369_v47 = vadd.f32 %v3289_v19, %v4771_v34 }
 0x1d0   : > { %2744 = vst [vmem:[%s4785_s29 + $0xd0] sm:$0xff] %v1463_v20  ;;  %v1466_v8 = vadd.f32 %v3353_v16, %v1369_v47  ;;  %v3290_v53 = vpop.f32.mrb[56].mxu0 }
 0x1d1   : > { %v3354_v24 = vpop.f32.mrb[56].mxu1  ;;  %v3291_v10 = vpop.f32.mrb[57].mxu0 }
 0x1d2   : > { %v3355_v54 = vpop.f32.mrb[57].mxu1  ;;  %2745 = vst [vmem:[%s4785_s29 + $0xd8] sm:$0xff] %v1466_v8  ;;  %v3292_v23 = vadd.f32 %v3291_v10, %v3290_v53  ;;  %v3293_v46 = vpop.f32.mrb[58].mxu0 }
 0x1d3   : > { %v3356_v42 = vadd.f32 %v3355_v54, %v3354_v24  ;;  %v3357_v28 = vpop.f32.mrb[58].mxu1  ;;  %v3294_v0 = vpop.f32.mrb[59].mxu0 }
 0x1d4   : > { %v3358_v13 = vpop.f32.mrb[59].mxu1  ;;  %v1374_v14 = vadd.f32 %v3292_v23, %v4771_v34  ;;  %v3295_v4 = vadd.f32 %v3294_v0, %v3293_v46 }
 0x1d5   : > { %v3359_v29 = vadd.f32 %v3358_v13, %v3357_v28 }
 0x1d6   : > { %v1471_v22 = vadd.f32 %v3356_v42, %v1374_v14  ;;  %v1377_v44 = vadd.f32 %v3295_v4, %v4771_v34 }
 0x1d8   : > { %2746 = vst [vmem:[%s4785_s29 + $0xe0] sm:$0xff] %v1471_v22  ;;  %v1474_v43 = vadd.f32 %v3359_v29, %v1377_v44  ;;  %v3296_v49 = vpop.f32.mrb[60].mxu0 }
 0x1d9   : > { %v3360_v45 = vpop.f32.mrb[60].mxu1  ;;  %v3297_v57 = vpop.f32.mrb[61].mxu0 }
 0x1da   : > { %v3361_v61 = vpop.f32.mrb[61].mxu1  ;;  %2747 = vst [vmem:[%s4785_s29 + $0xe8] sm:$0xff] %v1474_v43  ;;  %v3298_v12 = vadd.f32 %v3297_v57, %v3296_v49  ;;  %v3299_v15 = vpop.f32.mrb[62].mxu0 }
 0x1db   : > { %v3362_v58 = vadd.f32 %v3361_v61, %v3360_v45  ;;  %v3363_v37 = vpop.f32.mrb[62].mxu1  ;;  %v3300_v1 = vpop.f32.mrb[63].mxu0 }
 0x1dc   : > { %v3364_v27 = vpop.f32.mrb[63].mxu1  ;;  %v1382_v32 = vadd.f32 %v3298_v12, %v4771_v34  ;;  %v3301_v33 = vadd.f32 %v3300_v1, %v3299_v15 }
 0x1dd   : > { %v3365_v48 = vadd.f32 %v3364_v27, %v3363_v37 }
 0x1de   : > { %v1479_v38 = vadd.f32 %v3362_v58, %v1382_v32  ;;  %v1385_v21 = vadd.f32 %v3301_v33, %v4771_v34 }
 0x1e0   : > { %2748 = vst [vmem:[%s4785_s29 + $0xf0] sm:$0xff] %v1479_v38  ;;  %v1482_v51 = vadd.f32 %v3365_v48, %v1385_v21  ;;  %v3382_v52 = vpop.f32.mrb[64].mxu0 }
 0x1e1   : > { %v3446_v50 = vpop.f32.mrb[64].mxu1  ;;  %v3383_v25 = vpop.f32.mrb[65].mxu0 }
 0x1e2   : > { %v3447_v39 = vpop.f32.mrb[65].mxu1  ;;  %2749 = vst [vmem:[%s4785_s29 + $0xf8] sm:$0xff] %v1482_v51  ;;  %v3384_v41 = vadd.f32 %v3383_v25, %v3382_v52  ;;  %v3385_v55 = vpop.f32.mrb[66].mxu0 }
 0x1e3   : > { %v3448_v40 = vadd.f32 %v3447_v39, %v3446_v50  ;;  %v3449_v26 = vpop.f32.mrb[66].mxu1  ;;  %v3386_v62 = vpop.f32.mrb[67].mxu0 }
 0x1e4   : > { %v3450_v63 = vpop.f32.mrb[67].mxu1  ;;  %v1827_v2 = vadd.f32 %v3384_v41, %v4771_v34  ;;  %v3387_v56 = vadd.f32 %v3386_v62, %v3385_v55 }
 0x1e5   : > { %v3451_v18 = vadd.f32 %v3450_v63, %v3449_v26 }
 0x1e6   : > { %v1924_v3 = vadd.f32 %v3448_v40, %v1827_v2  ;;  %v1830_v30 = vadd.f32 %v3387_v56, %v4771_v34 }
 0x1e8   : > { %2782 = vst [vmem:[%s4785_s29 + $0x100] sm:$0xff] %v1924_v3  ;;  %v1927_v60 = vadd.f32 %v3451_v18, %v1830_v30  ;;  %v3388_v5 = vpop.f32.mrb[68].mxu0 }
 0x1e9   : > { %v3452_v36 = vpop.f32.mrb[68].mxu1  ;;  %v3389_v59 = vpop.f32.mrb[69].mxu0 }
 0x1ea   : > { %v3453_v6 = vpop.f32.mrb[69].mxu1  ;;  %2783 = vst [vmem:[%s4785_s29 + $0x108] sm:$0xff] %v1927_v60  ;;  %v3390_v31 = vadd.f32 %v3389_v59, %v3388_v5  ;;  %v3391_v11 = vpop.f32.mrb[70].mxu0 }
 0x1eb   : > { %v3454_v7 = vadd.f32 %v3453_v6, %v3452_v36  ;;  %v3455_v9 = vpop.f32.mrb[70].mxu1  ;;  %v3392_v16 = vpop.f32.mrb[71].mxu0 }
 0x1ec   : > { %v3456_v35 = vpop.f32.mrb[71].mxu1  ;;  %v1835_v19 = vadd.f32 %v3390_v31, %v4771_v34  ;;  %v3393_v20 = vadd.f32 %v3392_v16, %v3391_v11 }
 0x1ed   : > { %v3457_v17 = vadd.f32 %v3456_v35, %v3455_v9 }
 0x1ee   : > { %v1932_v47 = vadd.f32 %v3454_v7, %v1835_v19  ;;  %v1838_v24 = vadd.f32 %v3393_v20, %v4771_v34 }
 0x1f0   : > { %2784 = vst [vmem:[%s4785_s29 + $0x110] sm:$0xff] %v1932_v47  ;;  %v1935_v53 = vadd.f32 %v3457_v17, %v1838_v24  ;;  %v3394_v54 = vpop.f32.mrb[72].mxu0 }
 0x1f1   : > { %v3458_v8 = vpop.f32.mrb[72].mxu1  ;;  %v3395_v42 = vpop.f32.mrb[73].mxu0 }
 0x1f2   : > { %v3459_v10 = vpop.f32.mrb[73].mxu1  ;;  %2785 = vst [vmem:[%s4785_s29 + $0x118] sm:$0xff] %v1935_v53  ;;  %v3396_v46 = vadd.f32 %v3395_v42, %v3394_v54  ;;  %v3397_v13 = vpop.f32.mrb[74].mxu0 }
 0x1f3   : > { %v3460_v28 = vadd.f32 %v3459_v10, %v3458_v8  ;;  %v3461_v23 = vpop.f32.mrb[74].mxu1  ;;  %v3398_v29 = vpop.f32.mrb[75].mxu0 }
 0x1f4   : > { %v3462_v0 = vpop.f32.mrb[75].mxu1  ;;  %v1843_v4 = vadd.f32 %v3396_v46, %v4771_v34  ;;  %v3399_v22 = vadd.f32 %v3398_v29, %v3397_v13 }
 0x1f5   : > { %v3463_v14 = vadd.f32 %v3462_v0, %v3461_v23 }
 0x1f6   : > { %v1940_v44 = vadd.f32 %v3460_v28, %v1843_v4  ;;  %v1846_v45 = vadd.f32 %v3399_v22, %v4771_v34 }
 0x1f8   : > { %2786 = vst [vmem:[%s4785_s29 + $0x120] sm:$0xff] %v1940_v44  ;;  %v1943_v49 = vadd.f32 %v3463_v14, %v1846_v45  ;;  %v3400_v61 = vpop.f32.mrb[76].mxu0 }
 0x1f9   : > { %v3464_v43 = vpop.f32.mrb[76].mxu1  ;;  %v3401_v58 = vpop.f32.mrb[77].mxu0 }
 0x1fa   : > { %v3465_v57 = vpop.f32.mrb[77].mxu1  ;;  %2787 = vst [vmem:[%s4785_s29 + $0x128] sm:$0xff] %v1943_v49  ;;  %v3402_v15 = vadd.f32 %v3401_v58, %v3400_v61  ;;  %v3403_v27 = vpop.f32.mrb[78].mxu0 }
 0x1fb   : > { %v3466_v37 = vadd.f32 %v3465_v57, %v3464_v43  ;;  %v3467_v12 = vpop.f32.mrb[78].mxu1  ;;  %v3404_v48 = vpop.f32.mrb[79].mxu0 }
 0x1fc   : > { %v3468_v1 = vpop.f32.mrb[79].mxu1  ;;  %v1851_v33 = vadd.f32 %v3402_v15, %v4771_v34  ;;  %v3405_v38 = vadd.f32 %v3404_v48, %v3403_v27 }
 0x1fd   : > { %v3469_v32 = vadd.f32 %v3468_v1, %v3467_v12 }
 0x1fe   : > { %v1948_v21 = vadd.f32 %v3466_v37, %v1851_v33  ;;  %v1854_v50 = vadd.f32 %v3405_v38, %v4771_v34 }
 0x200   : > { %2788 = vst [vmem:[%s4785_s29 + $0x130] sm:$0xff] %v1948_v21  ;;  %v1951_v52 = vadd.f32 %v3469_v32, %v1854_v50  ;;  %v3406_v39 = vpop.f32.mrb[80].mxu0 }
 0x201   : > { %v3470_v51 = vpop.f32.mrb[80].mxu1  ;;  %v3407_v40 = vpop.f32.mrb[81].mxu0 }
 0x202   : > { %v3471_v25 = vpop.f32.mrb[81].mxu1  ;;  %2789 = vst [vmem:[%s4785_s29 + $0x138] sm:$0xff] %v1951_v52  ;;  %v3408_v55 = vadd.f32 %v3407_v40, %v3406_v39  ;;  %v3409_v63 = vpop.f32.mrb[82].mxu0 }
 0x203   : > { %v3472_v26 = vadd.f32 %v3471_v25, %v3470_v51  ;;  %v3473_v41 = vpop.f32.mrb[82].mxu1  ;;  %v3410_v18 = vpop.f32.mrb[83].mxu0 }
 0x204   : > { %v3474_v62 = vpop.f32.mrb[83].mxu1  ;;  %v1859_v56 = vadd.f32 %v3408_v55, %v4771_v34  ;;  %v3411_v3 = vadd.f32 %v3410_v18, %v3409_v63 }
 0x205   : > { %v3475_v2 = vadd.f32 %v3474_v62, %v3473_v41 }
 0x206   : > { %v1956_v30 = vadd.f32 %v3472_v26, %v1859_v56  ;;  %v1862_v36 = vadd.f32 %v3411_v3, %v4771_v34 }
 0x208   : > { %2790 = vst [vmem:[%s4785_s29 + $0x140] sm:$0xff] %v1956_v30  ;;  %v1959_v5 = vadd.f32 %v3475_v2, %v1862_v36  ;;  %v3412_v6 = vpop.f32.mrb[84].mxu0 }
 0x209   : > { %v3476_v60 = vpop.f32.mrb[84].mxu1  ;;  %v3413_v7 = vpop.f32.mrb[85].mxu0 }
 0x20a   : > { %v3477_v59 = vpop.f32.mrb[85].mxu1  ;;  %2791 = vst [vmem:[%s4785_s29 + $0x148] sm:$0xff] %v1959_v5  ;;  %v3414_v11 = vadd.f32 %v3413_v7, %v3412_v6  ;;  %v3415_v35 = vpop.f32.mrb[86].mxu0 }
 0x20b   : > { %v3478_v9 = vadd.f32 %v3477_v59, %v3476_v60  ;;  %v3479_v31 = vpop.f32.mrb[86].mxu1  ;;  %v3416_v17 = vpop.f32.mrb[87].mxu0 }
 0x20c   : > { %v3480_v16 = vpop.f32.mrb[87].mxu1  ;;  %v1867_v20 = vadd.f32 %v3414_v11, %v4771_v34  ;;  %v3417_v47 = vadd.f32 %v3416_v17, %v3415_v35 }
 0x20d   : > { %v3481_v19 = vadd.f32 %v3480_v16, %v3479_v31 }
 0x20e   : > { %v1964_v24 = vadd.f32 %v3478_v9, %v1867_v20  ;;  %v1870_v8 = vadd.f32 %v3417_v47, %v4771_v34 }
 0x210   : > { %2792 = vst [vmem:[%s4785_s29 + $0x150] sm:$0xff] %v1964_v24  ;;  %v1967_v54 = vadd.f32 %v3481_v19, %v1870_v8  ;;  %v3418_v10 = vpop.f32.mrb[88].mxu0 }
 0x211   : > { %v3482_v53 = vpop.f32.mrb[88].mxu1  ;;  %v3419_v28 = vpop.f32.mrb[89].mxu0 }
 0x212   : > { %v3483_v42 = vpop.f32.mrb[89].mxu1  ;;  %2793 = vst [vmem:[%s4785_s29 + $0x158] sm:$0xff] %v1967_v54  ;;  %v3420_v13 = vadd.f32 %v3419_v28, %v3418_v10  ;;  %v3421_v0 = vpop.f32.mrb[90].mxu0 }
 0x213   : > { %v3484_v23 = vadd.f32 %v3483_v42, %v3482_v53  ;;  %v3485_v46 = vpop.f32.mrb[90].mxu1  ;;  %v3422_v14 = vpop.f32.mrb[91].mxu0 }
 0x214   : > { %v3486_v29 = vpop.f32.mrb[91].mxu1  ;;  %v1875_v22 = vadd.f32 %v3420_v13, %v4771_v34  ;;  %v3423_v44 = vadd.f32 %v3422_v14, %v3421_v0 }
 0x215   : > { %v3487_v4 = vadd.f32 %v3486_v29, %v3485_v46 }
 0x216   : > { %v1972_v45 = vadd.f32 %v3484_v23, %v1875_v22  ;;  %v1878_v43 = vadd.f32 %v3423_v44, %v4771_v34 }
 0x218   : > { %2794 = vst [vmem:[%s4785_s29 + $0x160] sm:$0xff] %v1972_v45  ;;  %v1975_v61 = vadd.f32 %v3487_v4, %v1878_v43  ;;  %v3424_v57 = vpop.f32.mrb[92].mxu0 }
 0x219   : > { %v3488_v49 = vpop.f32.mrb[92].mxu1  ;;  %v3425_v37 = vpop.f32.mrb[93].mxu0 }
 0x21a   : > { %v3489_v58 = vpop.f32.mrb[93].mxu1  ;;  %2795 = vst [vmem:[%s4785_s29 + $0x168] sm:$0xff] %v1975_v61  ;;  %v3426_v27 = vadd.f32 %v3425_v37, %v3424_v57  ;;  %v3427_v1 = vpop.f32.mrb[94].mxu0 }
 0x21b   : > { %v3490_v12 = vadd.f32 %v3489_v58, %v3488_v49  ;;  %v3491_v15 = vpop.f32.mrb[94].mxu1  ;;  %v3428_v32 = vpop.f32.mrb[95].mxu0 }
 0x21c   : > { %v3492_v48 = vpop.f32.mrb[95].mxu1  ;;  %v1883_v38 = vadd.f32 %v3426_v27, %v4771_v34  ;;  %v3429_v21 = vadd.f32 %v3428_v32, %v3427_v1 }
 0x21d   : > { %v3493_v33 = vadd.f32 %v3492_v48, %v3491_v15 }
 0x21e   : > { %v1980_v50 = vadd.f32 %v3490_v12, %v1883_v38  ;;  %v1886_v51 = vadd.f32 %v3429_v21, %v4771_v34 }
 0x220   : > { %2796 = vst [vmem:[%s4785_s29 + $0x170] sm:$0xff] %v1980_v50  ;;  %v1983_v39 = vadd.f32 %v3493_v33, %v1886_v51  ;;  %v3510_v25 = vpop.f32.mrb[96].mxu0 }
 0x221   : > { %v3574_v52 = vpop.f32.mrb[96].mxu1  ;;  %v3511_v26 = vpop.f32.mrb[97].mxu0 }
 0x222   : > { %v3575_v40 = vpop.f32.mrb[97].mxu1  ;;  %2797 = vst [vmem:[%s4785_s29 + $0x178] sm:$0xff] %v1983_v39  ;;  %v3512_v63 = vadd.f32 %v3511_v26, %v3510_v25  ;;  %v3513_v62 = vpop.f32.mrb[98].mxu0 }
 0x223   : > { %v3576_v41 = vadd.f32 %v3575_v40, %v3574_v52  ;;  %v3577_v55 = vpop.f32.mrb[98].mxu1  ;;  %v3514_v2 = vpop.f32.mrb[99].mxu0 }
 0x224   : > { %v3578_v18 = vpop.f32.mrb[99].mxu1  ;;  %v2328_v3 = vadd.f32 %v3512_v63, %v4771_v34  ;;  %v3515_v30 = vadd.f32 %v3514_v2, %v3513_v62 }
 0x225   : > { %v3579_v56 = vadd.f32 %v3578_v18, %v3577_v55 }
 0x226   : > { %v2425_v36 = vadd.f32 %v3576_v41, %v2328_v3  ;;  %v2331_v60 = vadd.f32 %v3515_v30, %v4771_v34 }
 0x228   : > { %2830 = vst [vmem:[%s4785_s29 + $0x180] sm:$0xff] %v2425_v36  ;;  %v2428_v6 = vadd.f32 %v3579_v56, %v2331_v60  ;;  %v3516_v59 = vpop.f32.mrb[100].mxu0 }
 0x229   : > { %v3580_v5 = vpop.f32.mrb[100].mxu1  ;;  %v3517_v9 = vpop.f32.mrb[101].mxu0 }
 0x22a   : > { %v3581_v7 = vpop.f32.mrb[101].mxu1  ;;  %2831 = vst [vmem:[%s4785_s29 + $0x188] sm:$0xff] %v2428_v6  ;;  %v3518_v35 = vadd.f32 %v3517_v9, %v3516_v59  ;;  %v3519_v16 = vpop.f32.mrb[102].mxu0 }
 0x22b   : > { %v3582_v31 = vadd.f32 %v3581_v7, %v3580_v5  ;;  %v3583_v11 = vpop.f32.mrb[102].mxu1  ;;  %v3520_v19 = vpop.f32.mrb[103].mxu0 }
 0x22c   : > { %v3584_v17 = vpop.f32.mrb[103].mxu1  ;;  %v2336_v47 = vadd.f32 %v3518_v35, %v4771_v34  ;;  %v3521_v24 = vadd.f32 %v3520_v19, %v3519_v16 }
 0x22d   : > { %v3585_v20 = vadd.f32 %v3584_v17, %v3583_v11 }
 0x22e   : > { %v2433_v8 = vadd.f32 %v3582_v31, %v2336_v47  ;;  %v2339_v53 = vadd.f32 %v3521_v24, %v4771_v34 }
 0x230   : > { %2832 = vst [vmem:[%s4785_s29 + $0x190] sm:$0xff] %v2433_v8  ;;  %v2436_v10 = vadd.f32 %v3585_v20, %v2339_v53  ;;  %v3522_v42 = vpop.f32.mrb[104].mxu0 }
 0x231   : > { %v3586_v54 = vpop.f32.mrb[104].mxu1  ;;  %v3523_v23 = vpop.f32.mrb[105].mxu0 }
 0x232   : > { %v3587_v28 = vpop.f32.mrb[105].mxu1  ;;  %2833 = vst [vmem:[%s4785_s29 + $0x198] sm:$0xff] %v2436_v10  ;;  %v3524_v0 = vadd.f32 %v3523_v23, %v3522_v42  ;;  %v3525_v29 = vpop.f32.mrb[106].mxu0 }
 0x233   : > { %v3588_v46 = vadd.f32 %v3587_v28, %v3586_v54  ;;  %v3589_v13 = vpop.f32.mrb[106].mxu1  ;;  %v3526_v4 = vpop.f32.mrb[107].mxu0 }
 0x234   : > { %v3590_v14 = vpop.f32.mrb[107].mxu1  ;;  %v2344_v44 = vadd.f32 %v3524_v0, %v4771_v34  ;;  %v3527_v45 = vadd.f32 %v3526_v4, %v3525_v29 }
 0x235   : > { %v3591_v22 = vadd.f32 %v3590_v14, %v3589_v13 }
 0x236   : > { %v2441_v43 = vadd.f32 %v3588_v46, %v2344_v44  ;;  %v2347_v49 = vadd.f32 %v3527_v45, %v4771_v34  ;;  %v4927_v34 = vld [vmem:[%s5010_s2] ss:$0 sm:$0xff] }
 0x238   : > { %2834 = vst [vmem:[%s4785_s29 + $0x1a0] sm:$0xff] %v2441_v43  ;;  %v2444_v57 = vadd.f32 %v3591_v22, %v2347_v49  ;;  %v3528_v58 = vpop.f32.mrb[108].mxu0 }
 0x239   : > { %v3592_v61 = vpop.f32.mrb[108].mxu1  ;;  %v3529_v12 = vpop.f32.mrb[109].mxu0 }
 0x23a   : > { %v3593_v37 = vpop.f32.mrb[109].mxu1  ;;  %2835 = vst [vmem:[%s4785_s29 + $0x1a8] sm:$0xff] %v2444_v57  ;;  %v3530_v1 = vadd.f32 %v3529_v12, %v3528_v58  ;;  %v3531_v48 = vpop.f32.mrb[110].mxu0 }
 0x23b   : > { %v3594_v15 = vadd.f32 %v3593_v37, %v3592_v61  ;;  %v3595_v27 = vpop.f32.mrb[110].mxu1  ;;  %v3532_v33 = vpop.f32.mrb[111].mxu0 }
 0x23c   : > { %v3596_v32 = vpop.f32.mrb[111].mxu1  ;;  %v2352_v21 = vadd.f32 %v4927_v34, %v3530_v1  ;;  %v3533_v50 = vadd.f32 %v3532_v33, %v3531_v48 }
 0x23d   : > { %v3597_v38 = vadd.f32 %v3596_v32, %v3595_v27 }
 0x23e   : > { %v2449_v51 = vadd.f32 %v3594_v15, %v2352_v21  ;;  %v2355_v52 = vadd.f32 %v4927_v34, %v3533_v50 }
 0x240   : > { %2836 = vst [vmem:[%s4785_s29 + $0x1b0] sm:$0xff] %v2449_v51  ;;  %v2452_v25 = vadd.f32 %v3597_v38, %v2355_v52  ;;  %v3534_v40 = vpop.f32.mrb[112].mxu0 }
 0x241   : > { %v3598_v39 = vpop.f32.mrb[112].mxu1  ;;  %v3535_v41 = vpop.f32.mrb[113].mxu0 }
 0x242   : > { %v3599_v26 = vpop.f32.mrb[113].mxu1  ;;  %2837 = vst [vmem:[%s4785_s29 + $0x1b8] sm:$0xff] %v2452_v25  ;;  %v3536_v62 = vadd.f32 %v3535_v41, %v3534_v40  ;;  %v3537_v18 = vpop.f32.mrb[114].mxu0 }
 0x243   : > { %v3600_v55 = vadd.f32 %v3599_v26, %v3598_v39  ;;  %v3601_v63 = vpop.f32.mrb[114].mxu1  ;;  %v3538_v56 = vpop.f32.mrb[115].mxu0 }
 0x244   : > { %v3602_v2 = vpop.f32.mrb[115].mxu1  ;;  %v2360_v30 = vadd.f32 %v4927_v34, %v3536_v62  ;;  %v3539_v36 = vadd.f32 %v3538_v56, %v3537_v18 }
 0x245   : > { %v3603_v3 = vadd.f32 %v3602_v2, %v3601_v63 }
 0x246   : > { %v2457_v60 = vadd.f32 %v3600_v55, %v2360_v30  ;;  %v2363_v5 = vadd.f32 %v4927_v34, %v3539_v36 }
 0x248   : > { %2838 = vst [vmem:[%s4785_s29 + $0x1c0] sm:$0xff] %v2457_v60  ;;  %v2460_v59 = vadd.f32 %v3603_v3, %v2363_v5  ;;  %v3540_v7 = vpop.f32.mrb[116].mxu0 }
 0x249   : > { %v3604_v6 = vpop.f32.mrb[116].mxu1  ;;  %v3541_v31 = vpop.f32.mrb[117].mxu0 }
 0x24a   : > { %v3605_v9 = vpop.f32.mrb[117].mxu1  ;;  %2839 = vst [vmem:[%s4785_s29 + $0x1c8] sm:$0xff] %v2460_v59  ;;  %v3542_v16 = vadd.f32 %v3541_v31, %v3540_v7  ;;  %v3543_v17 = vpop.f32.mrb[118].mxu0 }
 0x24b   : > { %v3606_v11 = vadd.f32 %v3605_v9, %v3604_v6  ;;  %v3607_v35 = vpop.f32.mrb[118].mxu1  ;;  %v3544_v20 = vpop.f32.mrb[119].mxu0 }
 0x24c   : > { %v3608_v19 = vpop.f32.mrb[119].mxu1  ;;  %v2368_v24 = vadd.f32 %v4927_v34, %v3542_v16  ;;  %v3545_v8 = vadd.f32 %v3544_v20, %v3543_v17 }
 0x24d   : > { %v3609_v47 = vadd.f32 %v3608_v19, %v3607_v35 }
 0x24e   : > { %v2465_v53 = vadd.f32 %v3606_v11, %v2368_v24  ;;  %v2371_v54 = vadd.f32 %v4927_v34, %v3545_v8 }
 0x250   : > { %2840 = vst [vmem:[%s4785_s29 + $0x1d0] sm:$0xff] %v2465_v53  ;;  %v2468_v42 = vadd.f32 %v3609_v47, %v2371_v54  ;;  %v3546_v28 = vpop.f32.mrb[120].mxu0 }
 0x251   : > { %v3610_v10 = vpop.f32.mrb[120].mxu1  ;;  %v3547_v46 = vpop.f32.mrb[121].mxu0 }
 0x252   : > { %v3611_v23 = vpop.f32.mrb[121].mxu1  ;;  %2841 = vst [vmem:[%s4785_s29 + $0x1d8] sm:$0xff] %v2468_v42  ;;  %v3548_v29 = vadd.f32 %v3547_v46, %v3546_v28  ;;  %v3549_v14 = vpop.f32.mrb[122].mxu0 }
 0x253   : > { %v3612_v13 = vadd.f32 %v3611_v23, %v3610_v10  ;;  %v3613_v0 = vpop.f32.mrb[122].mxu1  ;;  %v3550_v22 = vpop.f32.mrb[123].mxu0 }
 0x254   : > { %v3614_v4 = vpop.f32.mrb[123].mxu1  ;;  %v2376_v45 = vadd.f32 %v4927_v34, %v3548_v29  ;;  %v3551_v43 = vadd.f32 %v3550_v22, %v3549_v14 }
 0x255   : > { %v3615_v44 = vadd.f32 %v3614_v4, %v3613_v0 }
 0x256   : > { %v2473_v49 = vadd.f32 %v3612_v13, %v2376_v45  ;;  %v2379_v61 = vadd.f32 %v4927_v34, %v3551_v43 }
 0x258   : > { %2842 = vst [vmem:[%s4785_s29 + $0x1e0] sm:$0xff] %v2473_v49  ;;  %v2476_v58 = vadd.f32 %v3615_v44, %v2379_v61  ;;  %v3552_v37 = vpop.f32.mrb[124].mxu0 }
 0x259   : > { %v3616_v57 = vpop.f32.mrb[124].mxu1  ;;  %v3553_v15 = vpop.f32.mrb[125].mxu0 }
 0x25a   : > { %v3617_v12 = vpop.f32.mrb[125].mxu1  ;;  %2843 = vst [vmem:[%s4785_s29 + $0x1e8] sm:$0xff] %v2476_v58  ;;  %v3554_v48 = vadd.f32 %v3553_v15, %v3552_v37  ;;  %v3555_v32 = vpop.f32.mrb[126].mxu0 }
 0x25b   : > { %v3618_v27 = vadd.f32 %v3617_v12, %v3616_v57  ;;  %v3619_v1 = vpop.f32.mrb[126].mxu1  ;;  %v3556_v38 = vpop.f32.mrb[127].mxu0 }
 0x25c   : > { %v3620_v33 = vpop.f32.mrb[127].mxu1  ;;  %v2384_v50 = vadd.f32 %v4927_v34, %v3554_v48  ;;  %v3557_v51 = vadd.f32 %v3556_v38, %v3555_v32 }
 0x25d   : > { %v3621_v21 = vadd.f32 %v3620_v33, %v3619_v1 }
 0x25e   : > { %v2481_v52 = vadd.f32 %v3618_v27, %v2384_v50  ;;  %v2387_v39 = vadd.f32 %v4927_v34, %v3557_v51 }
 0x260   : > { %2844 = vst [vmem:[%s4785_s29 + $0x1f0] sm:$0xff] %v2481_v52  ;;  %v2484_v25 = vadd.f32 %v3621_v21, %v2387_v39 }
 0x262   : > { %2845 = vst [vmem:[%s4785_s29 + $0x1f8] sm:$0xff] %v2484_v25 }
 0x263   : > { %s2847_s11 = sshll.u32 %s4024_s18, 4  ;;  %s2848_s15 = sshll.u32 %s4028_s19, 7 }
 0x264   : > { %s2517_s26 = sadd.s32 %s2848_s15, %s2847_s11  ;;  %s2536_s23 = sshll.u32 %s4785_s29, 4  ;;  %s2537_s23 = int_to_ptr.vmem [resolvable:$true] %s2536_s23 }
 0x265   : > { %s2849_s4 = sshll.u32 %s2517_s26, 7  ;;  %s4049_s12 = smov 2048  }
 0x266   : > { %s2519_s20 = scalar_lea.hbm %s5011_s3, %s2849_s4  ;;  %p5044_p13 = scmp.ne.s32.totalorder %s5027_s28, 0 }
 0x267   : > { %s4050_s10 = smov 4096   ;;  %s4051_s6 = smov 16  }
 0x268   : > { %3628 = sst [smem:[#allocation10]] (%p5044_p13), %s4049_s12  ;;  %s4052_s18 = smov 128  }
 0x269   : > { %3629 = sst [smem:[#allocation10 + $0x1]] (%p5044_p13), %s4050_s10  ;;  %s4053_s19 = smov 8  }
 0x26a   : > { %3630 = sst [smem:[#allocation10 + $0x2]] (%p5044_p13), %s4051_s6  ;;  %s4054_s5 = smov [#allocation9]  }
 0x26b   : > { %3631 = sst [smem:[#allocation10 + $0x3]] (%p5044_p13), %s4052_s18  ;;  %s4055_s24 = smov 0  }
 0x26c   : > { %3632 = sst [smem:[#allocation10 + $0x4]] (%p5044_p13), %s4052_s18 }
 0x26d   : > { %3633 = sst [smem:[#allocation10 + $0x5]] (%p5044_p13), %s4053_s19 }
 0x26e   : > { %3634 = dma.general (%p5044_p13), %s2537_s23, 8192, %s2519_s20, %s2505_s30, %s4054_s5, [#allocation10], %s4055_s24, 0  }
 0x26f PF: > { %s5045_s29 = sld [smem:[#allocation14_spill]]  ;;  %s5046_s25 = sld [smem:[#allocation16_spill]] }
 0x270   : > { %p3653_p0 = scmp.ge.s32.totalorder %s4040_s22, 2 }
 0x275   : > { %s2564_s27 = sand.u32 1, %s5045_s29   ;;  %p5047_p2 = scmp.ne.s32.totalorder %s5046_s25, 0 }
 0x276   : > { %s2565_s11 = scalar_lea.sflag [#allocation5], %s2564_s27 }
 0x277   : > { %p3645_p5 = pnand %p3653_p0, %p5047_p2 }
 0x279   : > { %3995 = dma.done.wait (!%p3645_p5), %s2565_s11, 8192  }
 0x27a   : > { %3997 = vsyncadd (!%p3645_p5), %s2565_s11, 4294959104  ;;  %s20_s22 = sadd.s32 1, %s4040_s22   ;;  %s5048_s18 = sld [smem:[#allocation15_spill]] }
 0x27b   : > { %p17_p8 = scmp.ge.s32.totalorder %s20_s22, 6   ;;  %s5049_s20 = sld [smem:[#allocation17_spill]] }
 0x27c   : > { %s5050_s28 = sld [smem:[#allocation18_spill]]  ;;  %s5051_s12 = smov %s4004_s13 }
 0x27d   : > { %s5052_s13 = smov %s4008_s14  ;;  %s5053_s14 = smov %s4213_s1 }
 0x27e   : > { %s5054_s15 = smov %s4016_s16  ;;  %s5055_s16 = smov %s4020_s17 }
 0x27f   : > { %s5056_s17 = smov %s4208_s9  ;;  %s5057_s19 = smov %s4036_s21 }
 0x280   :  { %19 = sbr.rel (!%p17_p8) target bundleno = 12 (0xc), region = 98 }
 0x282   : > { %s5058_s21 = smov %s5050_s28 }
 0x287   :  { %2570 = vsyncpa [#allocation4], 1 }
 0x288   :  { %2572 = vsyncpa [#allocation4 + $0x1], 1 }
 0x289   :  { %2573 = vsyncpa [#allocation7], 1 }
 0x28a   :  { %2574 = vsyncpa [#allocation5], 1 }
 0x28b   :  { %2576 = vsyncpa [#allocation5 + $0x1], 1 }

</bundles_post_ra>
